<compile_context>
chip_gen: v7x
topology: tpu7x:2x2x1
jax: 0.10.0
libtpu: 0.0.40
codegen_flags: <defaults>
</compile_context>

<pallas_src>
import functools
import math

import jax
import jax.numpy as jnp
from jax import lax
from jax.experimental import pallas as pl
from jax.experimental.pallas import tpu as pltpu


# ---------------------------------------------------------------------------
# Tile selection helper
# ---------------------------------------------------------------------------
def _pick_tile(dim, candidates):
    """Largest candidate that evenly divides `dim`; fall back to the full dim."""
    for c in candidates:
        if c <= dim and dim % c == 0:
            return c
    return dim


# ---------------------------------------------------------------------------
# Linear: out = x @ w.T + b  with w in PyTorch (out_features, in_features) layout.
#   x: (M, K), w: (Nout, K), b: (Nout,)  ->  (M, Nout)
# ---------------------------------------------------------------------------
def _linear_kernel(x_ref, w_ref, b_ref, o_ref, acc_ref, *, mxu_dtype):
    kk = pl.program_id(2)

    @pl.when(kk == 0)
    def _init():
        acc_ref[...] = jnp.zeros_like(acc_ref)

    # Contract the last dim of both operands (PyTorch weight layout), so no
    # transposed-weight copy ever lives in HBM.  bf16 MXU inputs, f32 accumulate.
    acc_ref[...] += lax.dot_general(
        x_ref[...].astype(mxu_dtype),
        w_ref[...].astype(mxu_dtype),
        (((1,), (1,)), ((), ())),
        preferred_element_type=jnp.float32,
    )

    @pl.when(kk == pl.num_programs(2) - 1)
    def _finalize():
        o_ref[...] = (acc_ref[...] + b_ref[...].astype(jnp.float32)).astype(o_ref.dtype)


def linear(x, w, b, *, mxu_dtype, out_dtype=None):
    M, K = x.shape
    Nout = w.shape[0]
    out_dtype = out_dtype or x.dtype

    # Prefer large tiles (amortize ~0.35us per grid step); footprint stays small
    # (f32 512^3 tiles ~= 7 MiB double-buffered) on every generation.
    tm = _pick_tile(M, (512, 256, 128))
    tn = _pick_tile(Nout, (512, 256, 128))
    tk = _pick_tile(K, (512, 256, 128))
    grid = (M // tm, Nout // tn, K // tk)

    kernel = functools.partial(_linear_kernel, mxu_dtype=mxu_dtype)
    return pl.pallas_call(
        kernel,
        out_shape=jax.ShapeDtypeStruct((M, Nout), out_dtype),
        grid_spec=pltpu.PrefetchScalarGridSpec(
            num_scalar_prefetch=0,
            grid=grid,
            in_specs=[
                pl.BlockSpec((tm, tk), lambda i, j, kk: (i, kk)),
                pl.BlockSpec((tn, tk), lambda i, j, kk: (j, kk)),
                pl.BlockSpec((1, tn), lambda i, j, kk: (0, j)),
            ],
            out_specs=pl.BlockSpec((tm, tn), lambda i, j, kk: (i, j)),
            scratch_shapes=[pltpu.VMEM((tm, tn), jnp.float32)],
        ),
        compiler_params=pltpu.CompilerParams(
            dimension_semantics=("parallel", "parallel", "arbitrary"),
            vmem_limit_bytes=48 * 1024 * 1024,
        ),
    )(x, w, b.reshape(1, Nout))


# ---------------------------------------------------------------------------
# Attention kernels (flash-style online softmax over KV tiles)
# ---------------------------------------------------------------------------
def _attn_kernel_packed(q_ref, k_ref, v_ref, o_ref, m_ref, l_ref, acc_ref, *,
                        num_heads, mxu_dtype):
    """All heads per grid step; heads are contiguous D-wide column groups of E."""
    s_idx = pl.program_id(2)
    H = num_heads
    tl, E = q_ref.shape
    D = E // H

    @pl.when(s_idx == 0)
    def _init():
        m_ref[...] = jnp.full_like(m_ref, -jnp.inf)
        l_ref[...] = jnp.zeros_like(l_ref)
        acc_ref[...] = jnp.zeros_like(acc_ref)

    q = q_ref[...].astype(mxu_dtype)          # (tl, E)  scale already folded into Q proj
    k = k_ref[...].astype(mxu_dtype)          # (ts, E)
    v = v_ref[...].astype(mxu_dtype)          # (ts, E)

    o_parts = []
    alpha_parts = []
    for h in range(H):                        # static unroll; H is small here
        lo, hi = h * D, (h + 1) * D
        # scores: contract the head dim of both operands (no k.T materialized)
        s_h = lax.dot_general(
            q[:, lo:hi], k[:, lo:hi], (((1,), (1,)), ((), ())),
            preferred_element_type=jnp.float32)                  # (tl, ts) f32

        m_prev = m_ref[h]                                        # (tl, 1)
        m_new = jnp.maximum(m_prev, jnp.max(s_h, axis=-1, keepdims=True))
        alpha = jnp.exp(m_prev - m_new)
        p = jnp.exp(s_h - m_new)
        l_ref[h] = alpha * l_ref[h] + jnp.sum(p, axis=-1, keepdims=True)
        m_ref[h] = m_new

        o_parts.append(jnp.dot(p.astype(mxu_dtype), v[:, lo:hi],
                               preferred_element_type=jnp.float32))   # (tl, D)
        alpha_parts.append(jnp.broadcast_to(alpha, (tl, D)))

    # Single full-lane accumulator update per KV step (no masked per-head RMW).
    o_full = jnp.concatenate(o_parts, axis=-1)                   # (tl, E)
    alpha_full = jnp.concatenate(alpha_parts, axis=-1)           # (tl, E)
    acc_ref[...] = alpha_full * acc_ref[...] + o_full

    @pl.when(s_idx == pl.num_programs(2) - 1)
    def _finalize():
        inv_full = jnp.concatenate(
            [jnp.broadcast_to(pl.reciprocal(l_ref[h], approx=False), (tl, D))
             for h in range(H)], axis=-1)                        # (tl, E)
        o_ref[...] = (acc_ref[...] * inv_full).astype(o_ref.dtype)


def _attn_kernel_per_head(q_ref, k_ref, v_ref, o_ref, m_ref, l_ref, acc_ref, *,
                          mxu_dtype):
    """One (batch, head, q-tile) per grid step; full-lane D-wide blocks."""
    s_idx = pl.program_id(3)

    @pl.when(s_idx == 0)
    def _init():
        m_ref[...] = jnp.full_like(m_ref, -jnp.inf)
        l_ref[...] = jnp.zeros_like(l_ref)
        acc_ref[...] = jnp.zeros_like(acc_ref)

    q = q_ref[...].astype(mxu_dtype)          # (tl, D)
    k = k_ref[...].astype(mxu_dtype)          # (ts, D)
    s = lax.dot_general(q, k, (((1,), (1,)), ((), ())),
                        preferred_element_type=jnp.float32)      # (tl, ts)

    m_prev = m_ref[...]
    m_new = jnp.maximum(m_prev, jnp.max(s, axis=-1, keepdims=True))
    alpha = jnp.exp(m_prev - m_new)
    p = jnp.exp(s - m_new)
    l_ref[...] = alpha * l_ref[...] + jnp.sum(p, axis=-1, keepdims=True)
    m_ref[...] = m_new
    acc_ref[...] = alpha * acc_ref[...] + jnp.dot(
        p.astype(mxu_dtype), v_ref[...].astype(mxu_dtype),
        preferred_element_type=jnp.float32)

    @pl.when(s_idx == pl.num_programs(3) - 1)
    def _finalize():
        o_ref[...] = (acc_ref[...] * pl.reciprocal(l_ref[...], approx=False)
                      ).astype(o_ref.dtype)


def mha_core(q2, k2, v2, *, L, S, N, E, num_heads, mxu_dtype):
    """q2: (L*N, E), k2/v2: (S*N, E) with rows in seq-major (l, n) order -> (L*N, E)."""
    H = num_heads
    D = E // H
    dtype = q2.dtype
    itemsize = jnp.dtype(dtype).itemsize

    # Seq-major lane-sliced layout needs the lane block (E or D) to be a multiple
    # of 128 (or N == 1, where it spans the full lane dim).
    seq_major = (E % 128 == 0) or (N == 1)
    per_head = seq_major and (D % 128 == 0)

    tl = _pick_tile(L, (512, 256, 128))
    width = D if per_head else E
    # K + V, double-buffered, within ~24 MiB so q/out/acc + the (tl, ts) f32
    # score/prob temporaries still fit v7x's 64 MiB per-TC VMEM (v5e/v6e: 128 MiB).
    kv_cands = tuple(c for c in (2048, 1024, 512, 256, 128)
                     if 4 * c * width * itemsize <= 24 * 1024 * 1024)
    ts = _pick_tile(S, kv_cands if kv_cands else (128,))
    vmem_limit = 48 * 1024 * 1024

    if not seq_major:
        # Rare fallback (E not a multiple of 128): one batch-major transpose per
        # tensor so the lane block spans the full E.
        qa = q2.reshape(L, N, E).transpose(1, 0, 2)
        ka = k2.reshape(S, N, E).transpose(1, 0, 2)
        va = v2.reshape(S, N, E).transpose(1, 0, 2)
        kernel = functools.partial(_attn_kernel_packed, num_heads=H,
                                   mxu_dtype=mxu_dtype)
        out = pl.pallas_call(
            kernel,
            out_shape=jax.ShapeDtypeStruct((N, L, E), dtype),
            grid_spec=pltpu.PrefetchScalarGridSpec(
                num_scalar_prefetch=0,
                grid=(N, L // tl, S // ts),
                in_specs=[
                    pl.BlockSpec((None, tl, E), lambda n, i, s: (n, i, 0)),
                    pl.BlockSpec((None, ts, E), lambda n, i, s: (n, s, 0)),
                    pl.BlockSpec((None, ts, E), lambda n, i, s: (n, s, 0)),
                ],
                out_specs=pl.BlockSpec((None, tl, E), lambda n, i, s: (n, i, 0)),
                scratch_shapes=[pltpu.VMEM((H, tl, 1), jnp.float32),
                                pltpu.VMEM((H, tl, 1), jnp.float32),
                                pltpu.VMEM((tl, E), jnp.float32)]),
            compiler_params=pltpu.CompilerParams(
                dimension_semantics=("parallel", "parallel", "arbitrary"),
                vmem_limit_bytes=vmem_limit),
        )(qa, ka, va)
        return out.transpose(1, 0, 2).reshape(L * N, E)

    # Seq-major view: columns [n*E, (n+1)*E) of (L, N*E) hold batch n's features
    # (reshape of a contiguous array -> no HBM copy).
    qa = q2.reshape(L, N * E)
    ka = k2.reshape(S, N * E)
    va = v2.reshape(S, N * E)

    if per_head:
        # Heads on the grid: full-lane (tile, D) blocks, column block = n*H + h.
        kernel = functools.partial(_attn_kernel_per_head, mxu_dtype=mxu_dtype)
        out = pl.pallas_call(
            kernel,
            out_shape=jax.ShapeDtypeStruct((L, N * E), dtype),
            grid_spec=pltpu.PrefetchScalarGridSpec(
                num_scalar_prefetch=0,
                grid=(N, H, L // tl, S // ts),
                in_specs=[
                    pl.BlockSpec((tl, D), lambda n, h, i, s: (i, n * H + h)),
                    pl.BlockSpec((ts, D), lambda n, h, i, s: (s, n * H + h)),
                    pl.BlockSpec((ts, D), lambda n, h, i, s: (s, n * H + h)),
                ],
                out_specs=pl.BlockSpec((tl, D), lambda n, h, i, s: (i, n * H + h)),
                scratch_shapes=[pltpu.VMEM((tl, 1), jnp.float32),
                                pltpu.VMEM((tl, 1), jnp.float32),
                                pltpu.VMEM((tl, D), jnp.float32)]),
            compiler_params=pltpu.CompilerParams(
                dimension_semantics=("parallel", "parallel", "parallel", "arbitrary"),
                vmem_limit_bytes=vmem_limit),
        )(qa, ka, va)
    else:
        # Packed heads (small head_dim): lane-dense (tile, E) blocks per batch.
        kernel = functools.partial(_attn_kernel_packed, num_heads=H,
                                   mxu_dtype=mxu_dtype)
        out = pl.pallas_call(
            kernel,
            out_shape=jax.ShapeDtypeStruct((L, N * E), dtype),
            grid_spec=pltpu.PrefetchScalarGridSpec(
                num_scalar_prefetch=0,
                grid=(N, L // tl, S // ts),
                in_specs=[
                    pl.BlockSpec((tl, E), lambda n, i, s: (i, n)),
                    pl.BlockSpec((ts, E), lambda n, i, s: (s, n)),
                    pl.BlockSpec((ts, E), lambda n, i, s: (s, n)),
                ],
                out_specs=pl.BlockSpec((tl, E), lambda n, i, s: (i, n)),
                scratch_shapes=[pltpu.VMEM((H, tl, 1), jnp.float32),
                                pltpu.VMEM((H, tl, 1), jnp.float32),
                                pltpu.VMEM((tl, E), jnp.float32)]),
            compiler_params=pltpu.CompilerParams(
                dimension_semantics=("parallel", "parallel", "arbitrary"),
                vmem_limit_bytes=vmem_limit),
        )(qa, ka, va)
    return out.reshape(L * N, E)


# ---------------------------------------------------------------------------
# Full nn.MultiheadAttention(embed_dim, num_heads).forward(q, k, v)[0]
#   query: (L, N, E), key/value: (S, N, E)  ->  (L, N, E)
# ---------------------------------------------------------------------------
def multihead_attention(query, key, value, params, num_heads,
                        mxu_dtype=jnp.bfloat16):
    L, N, E = query.shape
    S = key.shape[0]
    D = E // num_heads
    scale = 1.0 / math.sqrt(D)

    in_w = params["in_proj_weight"]    # (3E, E)  PyTorch (out, in) layout
    in_b = params["in_proj_bias"]      # (3E,)
    out_w = params["out_proj_weight"]  # (E, E)
    out_b = params["out_proj_bias"]    # (E,)

    # Fold 1/sqrt(D) into the Q projection (one small E*E scale per call instead
    # of a per-KV-step VPU multiply inside the attention kernel).
    wq, bq = in_w[:E] * scale, in_b[:E] * scale
    wk, bk = in_w[E:2 * E], in_b[E:2 * E]
    wv, bv = in_w[2 * E:], in_b[2 * E:]

    # Projections run directly on the seq-major (rows = (l, n)) views of the
    # inputs -- no batch-major transposes and no activation stacking in HBM.
    # Q/K/V are stored in the MXU dtype (bf16) to halve attention DMA traffic.
    q2 = linear(query.reshape(L * N, E), wq, bq, mxu_dtype=mxu_dtype, out_dtype=mxu_dtype)
    k2 = linear(key.reshape(S * N, E), wk, bk, mxu_dtype=mxu_dtype, out_dtype=mxu_dtype)
    v2 = linear(value.reshape(S * N, E), wv, bv, mxu_dtype=mxu_dtype, out_dtype=mxu_dtype)

    o2 = mha_core(q2, k2, v2, L=L, S=S, N=N, E=E, num_heads=num_heads,
                  mxu_dtype=mxu_dtype)                              # (L*N, E)

    # Output projection; result is already in PyTorch's seq-first layout.
    out = linear(o2, out_w, out_b, mxu_dtype=mxu_dtype, out_dtype=query.dtype)
    return out.reshape(L, N, E)
    # TODO(synk): key_padding_mask / attn_mask / dropout are not part of this
    # module's forward() and are not implemented (fully-masked rows would need
    # the standard -inf guard if masks are added).


# ---------------------------------------------------------------------------
# Pure-JAX reference (f32) for the correctness check
# ---------------------------------------------------------------------------
def _reference(query, key, value, params, num_heads):
    L, N, E = query.shape
    S = key.shape[0]
    H, D = num_heads, E // num_heads
    in_w, in_b = params["in_proj_weight"], params["in_proj_bias"]
    out_w, out_b = params["out_proj_weight"], params["out_proj_bias"]
    wq, wk, wv = in_w[:E], in_w[E:2 * E], in_w[2 * E:]
    bq, bk, bv = in_b[:E], in_b[E:2 * E], in_b[2 * E:]
    q = query @ wq.T + bq
    k = key @ wk.T + bk
    v = value @ wv.T + bv
    qh = q.reshape(L, N, H, D).transpose(1, 2, 0, 3)   # (N, H, L, D)
    kh = k.reshape(S, N, H, D).transpose(1, 2, 0, 3)
    vh = v.reshape(S, N, H, D).transpose(1, 2, 0, 3)
    s = jnp.einsum("nhld,nhsd->nhls", qh, kh) / math.sqrt(D)
    p = jax.nn.softmax(s, axis=-1)
    o = jnp.einsum("nhls,nhsd->nhld", p, vh)
    o = o.transpose(2, 0, 1, 3).reshape(L, N, E)
    return o @ out_w.T + out_b


# ---------------------------------------------------------------------------
# Main
# ---------------------------------------------------------------------------
if __name__ == "__main__":
    master = jax.random.PRNGKey(0)

    def run_case(case_key, num_heads, model_dim, L, S, N):
        kq, kk_, kv_, kw1, kb1, kw2, kb2 = jax.random.split(case_key, 7)
        query = jax.random.normal(kq, (L, N, model_dim), dtype=jnp.float32)
        key_in = jax.random.normal(kk_, (S, N, model_dim), dtype=jnp.float32)
        value = jax.random.normal(kv_, (S, N, model_dim), dtype=jnp.float32)
        params = {
            "in_proj_weight": 0.05 * jax.random.normal(
                kw1, (3 * model_dim, model_dim), dtype=jnp.float32),
            "in_proj_bias": 0.01 * jax.random.normal(
                kb1, (3 * model_dim,), dtype=jnp.float32),
            "out_proj_weight": 0.05 * jax.random.normal(
                kw2, (model_dim, model_dim), dtype=jnp.float32),
            "out_proj_bias": 0.01 * jax.random.normal(
                kb2, (model_dim,), dtype=jnp.float32),
        }
        mha = jax.jit(multihead_attention, static_argnums=(4,))
        out = jax.block_until_ready(mha(query, key_in, value, params, num_heads))
        ref = _reference(query, key_in, value, params, num_heads)
        assert out.shape == (L, N, model_dim)
        # Tolerance reflects bf16 MXU inputs / bf16 QKV storage (f32 accumulation
        # and f32 softmax math throughout).
        assert jnp.allclose(out, ref, atol=3e-2, rtol=3e-2), (
            f"mismatch vs reference (heads={num_heads}, dim={model_dim})")

    k1, k2 = jax.random.split(master, 2)
    # Packed-heads kernel path (head_dim = 32 < 128).
    run_case(k1, num_heads=4, model_dim=128, L=8, S=8, N=2)
    # Heads-on-grid kernel path (head_dim = 128).
    run_case(k2, num_heads=2, model_dim=256, L=8, S=8, N=2)

    print("KERNEL_OK")
</pallas_src>

<mosaic_0001>
module attributes {stable_mosaic.version = 11 : i64} {
  func.func @_linear_kernel(%arg0: i32, %arg1: i32, %arg2: i32, %arg3: memref<16x128xf32, #tpu.memory_space<vmem>>, %arg4: memref<128x128xf32, #tpu.memory_space<vmem>>, %arg5: memref<1x128xf32, #tpu.memory_space<vmem>>, %arg6: memref<16x128xbf16, #tpu.memory_space<vmem>>, %arg7: memref<16x128xf32, #tpu.memory_space<vmem>>) attributes {dimension_semantics = [#tpu.dimension_semantics<parallel>, #tpu.dimension_semantics<parallel>, #tpu.dimension_semantics<arbitrary>], iteration_bounds = array<i64: 1, 1, 1>, scalar_prefetch = 0 : i64, scratch_operands = 1 : i64, tpu.core_type = #tpu.core_type<tc>, window_params = [{transform_indices = @transform_0, window_bounds = array<i64: 16, 128>}, {transform_indices = @transform_1, window_bounds = array<i64: 128, 128>}, {transform_indices = @transform_2, window_bounds = array<i64: 1, 128>}, {transform_indices = @transform_3, window_bounds = array<i64: 16, 128>}]} {
    %c0_i32 = arith.constant 0 : i32
    %0 = arith.cmpi eq, %arg2, %c0_i32 : i32
    %1 = arith.extui %0 : i1 to i32
    %c0_i32_0 = arith.constant 0 : i32
    %2 = arith.cmpi ne, %1, %c0_i32_0 : i32
    scf.if %2 {
      %cst_10 = arith.constant 0.000000e+00 : f32
      %14 = vector.broadcast %cst_10 : f32 to vector<16x128xf32>
      %c0_11 = arith.constant 0 : index
      %c0_12 = arith.constant 0 : index
      %15 = vector.load %arg7[%c0_11, %c0_12] : memref<16x128xf32, #tpu.memory_space<vmem>>, vector<16x128xf32>
      tpu.vector_store %arg7[%c0_11, %c0_12], %14 {strides = array<i32>} : memref<16x128xf32, #tpu.memory_space<vmem>>, vector<16x128xf32>,
    } else {
    }
    %c0 = arith.constant 0 : index
    %c0_1 = arith.constant 0 : index
    %3 = vector.load %arg7[%c0, %c0_1] : memref<16x128xf32, #tpu.memory_space<vmem>>, vector<16x128xf32>
    %c0_2 = arith.constant 0 : index
    %c0_3 = arith.constant 0 : index
    %4 = vector.load %arg3[%c0_2, %c0_3] : memref<16x128xf32, #tpu.memory_space<vmem>>, vector<16x128xf32>
    %5 = arith.truncf %4 : vector<16x128xf32> to vector<16x128xbf16>
    %c0_4 = arith.constant 0 : index
    %c0_5 = arith.constant 0 : index
    %6 = vector.load %arg4[%c0_4, %c0_5] : memref<128x128xf32, #tpu.memory_space<vmem>>, vector<128x128xf32>
    %7 = arith.truncf %6 : vector<128x128xf32> to vector<128x128xbf16>
    %cst = arith.constant dense<0.000000e+00> : vector<16x128xf32>
    %8 = tpu.matmul %5, %7, %cst {dimension_numbers = #tpu.dot_dimension_numbers<[1], [1], [0], [0], [0, 0, 1, 0], [], []>} : vector<16x128xbf16>, vector<128x128xbf16>, vector<16x128xf32> -> vector<16x128xf32>
    %9 = arith.addf %3, %8 : vector<16x128xf32>
    %c0_6 = arith.constant 0 : index
    %c0_7 = arith.constant 0 : index
    %10 = vector.load %arg7[%c0_6, %c0_7] : memref<16x128xf32, #tpu.memory_space<vmem>>, vector<16x128xf32>
    tpu.vector_store %arg7[%c0_6, %c0_7], %9 {strides = array<i32>} : memref<16x128xf32, #tpu.memory_space<vmem>>, vector<16x128xf32>,
    %c0_i32_8 = arith.constant 0 : i32
    %11 = arith.cmpi eq, %arg2, %c0_i32_8 : i32
    %12 = arith.extui %11 : i1 to i32
    %c0_i32_9 = arith.constant 0 : i32
    %13 = arith.cmpi ne, %12, %c0_i32_9 : i32
    scf.if %13 {
      %c0_10 = arith.constant 0 : index
      %c0_11 = arith.constant 0 : index
      %14 = vector.load %arg7[%c0_10, %c0_11] : memref<16x128xf32, #tpu.memory_space<vmem>>, vector<16x128xf32>
      %c0_12 = arith.constant 0 : index
      %c0_13 = arith.constant 0 : index
      %15 = vector.load %arg5[%c0_12, %c0_13] : memref<1x128xf32, #tpu.memory_space<vmem>>, vector<1x128xf32>
      %16 = vector.broadcast %15 : vector<1x128xf32> to vector<16x128xf32>
      %17 = arith.addf %14, %16 : vector<16x128xf32>
      %18 = arith.truncf %17 : vector<16x128xf32> to vector<16x128xbf16>
      %c0_14 = arith.constant 0 : index
      %c0_15 = arith.constant 0 : index
      %19 = vector.load %arg6[%c0_14, %c0_15] : memref<16x128xbf16, #tpu.memory_space<vmem>>, vector<16x128xbf16>
      tpu.vector_store %arg6[%c0_14, %c0_15], %18 {strides = array<i32>} : memref<16x128xbf16, #tpu.memory_space<vmem>>, vector<16x128xbf16>,
    } else {
    }
    return
  }
  func.func @transform_0(%arg0: i32, %arg1: i32, %arg2: i32) -> (i32, i32) {
    %c0_i32 = arith.constant 0 : i32
    return %arg0, %arg2 : i32, i32
  }
  func.func @transform_1(%arg0: i32, %arg1: i32, %arg2: i32) -> (i32, i32) {
    %c0_i32 = arith.constant 0 : i32
    return %arg1, %arg2 : i32, i32
  }
  func.func @transform_2(%arg0: i32, %arg1: i32, %arg2: i32) -> (i32, i32) {
    %c0_i32 = arith.constant 0 : i32
    %c0_i32_0 = arith.constant 0 : i32
    return %c0_i32, %arg1 : i32, i32
  }
  func.func @transform_3(%arg0: i32, %arg1: i32, %arg2: i32) -> (i32, i32) {
    %c0_i32 = arith.constant 0 : i32
    return %arg0, %arg1 : i32, i32
  }
}

module attributes {stable_mosaic.version = 11 : i64} {
  func.func @_linear_kernel(%arg0: i32, %arg1: i32, %arg2: i32, %arg3: memref<16x128xbf16, #tpu.memory_space<vmem>>, %arg4: memref<128x128xf32, #tpu.memory_space<vmem>>, %arg5: memref<1x128xf32, #tpu.memory_space<vmem>>, %arg6: memref<16x128xf32, #tpu.memory_space<vmem>>, %arg7: memref<16x128xf32, #tpu.memory_space<vmem>>) attributes {dimension_semantics = [#tpu.dimension_semantics<parallel>, #tpu.dimension_semantics<parallel>, #tpu.dimension_semantics<arbitrary>], iteration_bounds = array<i64: 1, 1, 1>, scalar_prefetch = 0 : i64, scratch_operands = 1 : i64, tpu.core_type = #tpu.core_type<tc>, window_params = [{transform_indices = @transform_0, window_bounds = array<i64: 16, 128>}, {transform_indices = @transform_1, window_bounds = array<i64: 128, 128>}, {transform_indices = @transform_2, window_bounds = array<i64: 1, 128>}, {transform_indices = @transform_3, window_bounds = array<i64: 16, 128>}]} {
    %c0_i32 = arith.constant 0 : i32
    %0 = arith.cmpi eq, %arg2, %c0_i32 : i32
    %1 = arith.extui %0 : i1 to i32
    %c0_i32_0 = arith.constant 0 : i32
    %2 = arith.cmpi ne, %1, %c0_i32_0 : i32
    scf.if %2 {
      %cst_10 = arith.constant 0.000000e+00 : f32
      %13 = vector.broadcast %cst_10 : f32 to vector<16x128xf32>
      %c0_11 = arith.constant 0 : index
      %c0_12 = arith.constant 0 : index
      %14 = vector.load %arg7[%c0_11, %c0_12] : memref<16x128xf32, #tpu.memory_space<vmem>>, vector<16x128xf32>
      tpu.vector_store %arg7[%c0_11, %c0_12], %13 {strides = array<i32>} : memref<16x128xf32, #tpu.memory_space<vmem>>, vector<16x128xf32>,
    } else {
    }
    %c0 = arith.constant 0 : index
    %c0_1 = arith.constant 0 : index
    %3 = vector.load %arg7[%c0, %c0_1] : memref<16x128xf32, #tpu.memory_space<vmem>>, vector<16x128xf32>
    %c0_2 = arith.constant 0 : index
    %c0_3 = arith.constant 0 : index
    %4 = vector.load %arg3[%c0_2, %c0_3] : memref<16x128xbf16, #tpu.memory_space<vmem>>, vector<16x128xbf16>
    %c0_4 = arith.constant 0 : index
    %c0_5 = arith.constant 0 : index
    %5 = vector.load %arg4[%c0_4, %c0_5] : memref<128x128xf32, #tpu.memory_space<vmem>>, vector<128x128xf32>
    %6 = arith.truncf %5 : vector<128x128xf32> to vector<128x128xbf16>
    %cst = arith.constant dense<0.000000e+00> : vector<16x128xf32>
    %7 = tpu.matmul %4, %6, %cst {dimension_numbers = #tpu.dot_dimension_numbers<[1], [1], [0], [0], [0, 0, 1, 0], [], []>} : vector<16x128xbf16>, vector<128x128xbf16>, vector<16x128xf32> -> vector<16x128xf32>
    %8 = arith.addf %3, %7 : vector<16x128xf32>
    %c0_6 = arith.constant 0 : index
    %c0_7 = arith.constant 0 : index
    %9 = vector.load %arg7[%c0_6, %c0_7] : memref<16x128xf32, #tpu.memory_space<vmem>>, vector<16x128xf32>
    tpu.vector_store %arg7[%c0_6, %c0_7], %8 {strides = array<i32>} : memref<16x128xf32, #tpu.memory_space<vmem>>, vector<16x128xf32>,
    %c0_i32_8 = arith.constant 0 : i32
    %10 = arith.cmpi eq, %arg2, %c0_i32_8 : i32
    %11 = arith.extui %10 : i1 to i32
    %c0_i32_9 = arith.constant 0 : i32
    %12 = arith.cmpi ne, %11, %c0_i32_9 : i32
    scf.if %12 {
      %c0_10 = arith.constant 0 : index
      %c0_11 = arith.constant 0 : index
      %13 = vector.load %arg7[%c0_10, %c0_11] : memref<16x128xf32, #tpu.memory_space<vmem>>, vector<16x128xf32>
      %c0_12 = arith.constant 0 : index
      %c0_13 = arith.constant 0 : index
      %14 = vector.load %arg5[%c0_12, %c0_13] : memref<1x128xf32, #tpu.memory_space<vmem>>, vector<1x128xf32>
      %15 = vector.broadcast %14 : vector<1x128xf32> to vector<16x128xf32>
      %16 = arith.addf %13, %15 : vector<16x128xf32>
      %c0_14 = arith.constant 0 : index
      %c0_15 = arith.constant 0 : index
      %17 = vector.load %arg6[%c0_14, %c0_15] : memref<16x128xf32, #tpu.memory_space<vmem>>, vector<16x128xf32>
      tpu.vector_store %arg6[%c0_14, %c0_15], %16 {strides = array<i32>} : memref<16x128xf32, #tpu.memory_space<vmem>>, vector<16x128xf32>,
    } else {
    }
    return
  }
  func.func @transform_0(%arg0: i32, %arg1: i32, %arg2: i32) -> (i32, i32) {
    %c0_i32 = arith.constant 0 : i32
    return %arg0, %arg2 : i32, i32
  }
  func.func @transform_1(%arg0: i32, %arg1: i32, %arg2: i32) -> (i32, i32) {
    %c0_i32 = arith.constant 0 : i32
    return %arg1, %arg2 : i32, i32
  }
  func.func @transform_2(%arg0: i32, %arg1: i32, %arg2: i32) -> (i32, i32) {
    %c0_i32 = arith.constant 0 : i32
    %c0_i32_0 = arith.constant 0 : i32
    return %c0_i32, %arg1 : i32, i32
  }
  func.func @transform_3(%arg0: i32, %arg1: i32, %arg2: i32) -> (i32, i32) {
    %c0_i32 = arith.constant 0 : i32
    return %arg0, %arg1 : i32, i32
  }
}

module attributes {stable_mosaic.version = 11 : i64} {
  func.func @_attn_kernel_packed(%arg0: i32, %arg1: i32, %arg2: i32, %arg3: memref<8x128xbf16, #tpu.memory_space<vmem>>, %arg4: memref<8x128xbf16, #tpu.memory_space<vmem>>, %arg5: memref<8x128xbf16, #tpu.memory_space<vmem>>, %arg6: memref<8x128xbf16, #tpu.memory_space<vmem>>, %arg7: memref<4x8x1xf32, #tpu.memory_space<vmem>>, %arg8: memref<4x8x1xf32, #tpu.memory_space<vmem>>, %arg9: memref<8x128xf32, #tpu.memory_space<vmem>>) attributes {dimension_semantics = [#tpu.dimension_semantics<parallel>, #tpu.dimension_semantics<parallel>, #tpu.dimension_semantics<arbitrary>], iteration_bounds = array<i64: 2, 1, 1>, scalar_prefetch = 0 : i64, scratch_operands = 3 : i64, tpu.core_type = #tpu.core_type<tc>, window_params = [{transform_indices = @transform_0, window_bounds = array<i64: 8, 128>}, {transform_indices = @transform_1, window_bounds = array<i64: 8, 128>}, {transform_indices = @transform_2, window_bounds = array<i64: 8, 128>}, {transform_indices = @transform_3, window_bounds = array<i64: 8, 128>}]} {
    %c0_i32 = arith.constant 0 : i32
    %0 = arith.cmpi eq, %arg2, %c0_i32 : i32
    %1 = arith.extui %0 : i1 to i32
    %c0_i32_0 = arith.constant 0 : i32
    %2 = arith.cmpi ne, %1, %c0_i32_0 : i32
    scf.if %2 {
      %cst_72 = arith.constant 0xFF800000 : f32
      %135 = vector.broadcast %cst_72 : f32 to vector<4x8x1xf32>
      %c0_73 = arith.constant 0 : index
      %c0_74 = arith.constant 0 : index
      %c0_75 = arith.constant 0 : index
      %136 = vector.load %arg7[%c0_73, %c0_74, %c0_75] : memref<4x8x1xf32, #tpu.memory_space<vmem>>, vector<4x8x1xf32>
      tpu.vector_store %arg7[%c0_73, %c0_74, %c0_75], %135 {strides = array<i32>} : memref<4x8x1xf32, #tpu.memory_space<vmem>>, vector<4x8x1xf32>,
      %cst_76 = arith.constant 0.000000e+00 : f32
      %137 = vector.broadcast %cst_76 : f32 to vector<4x8x1xf32>
      %c0_77 = arith.constant 0 : index
      %c0_78 = arith.constant 0 : index
      %c0_79 = arith.constant 0 : index
      %138 = vector.load %arg8[%c0_77, %c0_78, %c0_79] : memref<4x8x1xf32, #tpu.memory_space<vmem>>, vector<4x8x1xf32>
      tpu.vector_store %arg8[%c0_77, %c0_78, %c0_79], %137 {strides = array<i32>} : memref<4x8x1xf32, #tpu.memory_space<vmem>>, vector<4x8x1xf32>,
      %cst_80 = arith.constant 0.000000e+00 : f32
      %139 = vector.broadcast %cst_80 : f32 to vector<8x128xf32>
      %c0_81 = arith.constant 0 : index
      %c0_82 = arith.constant 0 : index
      %140 = vector.load %arg9[%c0_81, %c0_82] : memref<8x128xf32, #tpu.memory_space<vmem>>, vector<8x128xf32>
      tpu.vector_store %arg9[%c0_81, %c0_82], %139 {strides = array<i32>} : memref<8x128xf32, #tpu.memory_space<vmem>>, vector<8x128xf32>,
    } else {
    }
    %c0 = arith.constant 0 : index
    %c0_1 = arith.constant 0 : index
    %3 = vector.load %arg3[%c0, %c0_1] : memref<8x128xbf16, #tpu.memory_space<vmem>>, vector<8x128xbf16>
    %c0_2 = arith.constant 0 : index
    %c0_3 = arith.constant 0 : index
    %4 = vector.load %arg4[%c0_2, %c0_3] : memref<8x128xbf16, #tpu.memory_space<vmem>>, vector<8x128xbf16>
    %c0_4 = arith.constant 0 : index
    %c0_5 = arith.constant 0 : index
    %5 = vector.load %arg5[%c0_4, %c0_5] : memref<8x128xbf16, #tpu.memory_space<vmem>>, vector<8x128xbf16>
    %6 = vector.extract_strided_slice %3 {offsets = [0, 0], sizes = [8, 32], strides = [1, 1]} : vector<8x128xbf16> to vector<8x32xbf16>
    %7 = vector.extract_strided_slice %4 {offsets = [0, 0], sizes = [8, 32], strides = [1, 1]} : vector<8x128xbf16> to vector<8x32xbf16>
    %cst = arith.constant dense<0.000000e+00> : vector<8x8xf32>
    %8 = tpu.matmul %6, %7, %cst {dimension_numbers = #tpu.dot_dimension_numbers<[1], [1], [0], [0], [0, 0, 1, 0], [], []>} : vector<8x32xbf16>, vector<8x32xbf16>, vector<8x8xf32> -> vector<8x8xf32>
    %c0_6 = arith.constant 0 : index
    %c0_7 = arith.constant 0 : index
    %c0_8 = arith.constant 0 : index
    %9 = vector.load %arg7[%c0_6, %c0_7, %c0_8] : memref<4x8x1xf32, #tpu.memory_space<vmem>>, vector<1x8x1xf32>
    %10 = vector.shape_cast %9 : vector<1x8x1xf32> to vector<8x1xf32>
    %cst_9 = arith.constant dense<0xFF800000> : vector<8xf32>
    %11 = vector.multi_reduction <maximumf>, %8, %cst_9 [1] : vector<8x8xf32> to vector<8xf32>
    %12 = vector.shape_cast %11 : vector<8xf32> to vector<8x1xf32>
    %13 = arith.maximumf %10, %12 : vector<8x1xf32>
    %14 = arith.subf %10, %13 : vector<8x1xf32>
    %15 = math.exp %14 : vector<8x1xf32>
    %16 = vector.broadcast %13 : vector<8x1xf32> to vector<8x8xf32>
    %17 = arith.subf %8, %16 : vector<8x8xf32>
    %18 = math.exp %17 : vector<8x8xf32>
    %c0_10 = arith.constant 0 : index
    %c0_11 = arith.constant 0 : index
    %c0_12 = arith.constant 0 : index
    %19 = vector.load %arg8[%c0_10, %c0_11, %c0_12] : memref<4x8x1xf32, #tpu.memory_space<vmem>>, vector<1x8x1xf32>
    %20 = vector.shape_cast %19 : vector<1x8x1xf32> to vector<8x1xf32>
    %21 = arith.mulf %15, %20 : vector<8x1xf32>
    %cst_13 = arith.constant dense<0.000000e+00> : vector<8xf32>
    %22 = vector.multi_reduction <add>, %18, %cst_13 [1] : vector<8x8xf32> to vector<8xf32>
    %23 = vector.shape_cast %22 : vector<8xf32> to vector<8x1xf32>
    %24 = arith.addf %21, %23 : vector<8x1xf32>
    %c0_14 = arith.constant 0 : index
    %c0_15 = arith.constant 0 : index
    %c0_16 = arith.constant 0 : index
    %25 = vector.load %arg8[%c0_14, %c0_15, %c0_16] : memref<4x8x1xf32, #tpu.memory_space<vmem>>, vector<1x8x1xf32>
    %26 = vector.shape_cast %25 : vector<1x8x1xf32> to vector<8x1xf32>
    %27 = vector.shape_cast %24 : vector<8x1xf32> to vector<1x8x1xf32>
    tpu.vector_store %arg8[%c0_14, %c0_15, %c0_16], %27 {strides = array<i32>} : memref<4x8x1xf32, #tpu.memory_space<vmem>>, vector<1x8x1xf32>,
    %c0_17 = arith.constant 0 : index
    %c0_18 = arith.constant 0 : index
    %c0_19 = arith.constant 0 : index
    %28 = vector.load %arg7[%c0_17, %c0_18, %c0_19] : memref<4x8x1xf32, #tpu.memory_space<vmem>>, vector<1x8x1xf32>
    %29 = vector.shape_cast %28 : vector<1x8x1xf32> to vector<8x1xf32>
    %30 = vector.shape_cast %13 : vector<8x1xf32> to vector<1x8x1xf32>
    tpu.vector_store %arg7[%c0_17, %c0_18, %c0_19], %30 {strides = array<i32>} : memref<4x8x1xf32, #tpu.memory_space<vmem>>, vector<1x8x1xf32>,
    %31 = arith.truncf %18 : vector<8x8xf32> to vector<8x8xbf16>
    %32 = vector.extract_strided_slice %5 {offsets = [0, 0], sizes = [8, 32], strides = [1, 1]} : vector<8x128xbf16> to vector<8x32xbf16>
    %cst_20 = arith.constant dense<0.000000e+00> : vector<8x32xf32>
    %33 = tpu.matmul %31, %32, %cst_20 {dimension_numbers = #tpu.dot_dimension_numbers<[1], [0], [0], [1], [0, 0, 1, 1], [], []>} : vector<8x8xbf16>, vector<8x32xbf16>, vector<8x32xf32> -> vector<8x32xf32>
    %34 = vector.shape_cast %15 : vector<8x1xf32> to vector<8x1xf32>
    %35 = vector.broadcast %34 : vector<8x1xf32> to vector<8x32xf32>
    %36 = vector.extract_strided_slice %3 {offsets = [0, 32], sizes = [8, 32], strides = [1, 1]} : vector<8x128xbf16> to vector<8x32xbf16>
    %37 = vector.extract_strided_slice %4 {offsets = [0, 32], sizes = [8, 32], strides = [1, 1]} : vector<8x128xbf16> to vector<8x32xbf16>
    %cst_21 = arith.constant dense<0.000000e+00> : vector<8x8xf32>
    %38 = tpu.matmul %36, %37, %cst_21 {dimension_numbers = #tpu.dot_dimension_numbers<[1], [1], [0], [0], [0, 0, 1, 0], [], []>} : vector<8x32xbf16>, vector<8x32xbf16>, vector<8x8xf32> -> vector<8x8xf32>
    %c1 = arith.constant 1 : index
    %c0_22 = arith.constant 0 : index
    %c0_23 = arith.constant 0 : index
    %39 = vector.load %arg7[%c1, %c0_22, %c0_23] : memref<4x8x1xf32, #tpu.memory_space<vmem>>, vector<1x8x1xf32>
    %40 = vector.shape_cast %39 : vector<1x8x1xf32> to vector<8x1xf32>
    %cst_24 = arith.constant dense<0xFF800000> : vector<8xf32>
    %41 = vector.multi_reduction <maximumf>, %38, %cst_24 [1] : vector<8x8xf32> to vector<8xf32>
    %42 = vector.shape_cast %41 : vector<8xf32> to vector<8x1xf32>
    %43 = arith.maximumf %40, %42 : vector<8x1xf32>
    %44 = arith.subf %40, %43 : vector<8x1xf32>
    %45 = math.exp %44 : vector<8x1xf32>
    %46 = vector.broadcast %43 : vector<8x1xf32> to vector<8x8xf32>
    %47 = arith.subf %38, %46 : vector<8x8xf32>
    %48 = math.exp %47 : vector<8x8xf32>
    %c1_25 = arith.constant 1 : index
    %c0_26 = arith.constant 0 : index
    %c0_27 = arith.constant 0 : index
    %49 = vector.load %arg8[%c1_25, %c0_26, %c0_27] : memref<4x8x1xf32, #tpu.memory_space<vmem>>, vector<1x8x1xf32>
    %50 = vector.shape_cast %49 : vector<1x8x1xf32> to vector<8x1xf32>
    %51 = arith.mulf %45, %50 : vector<8x1xf32>
    %cst_28 = arith.constant dense<0.000000e+00> : vector<8xf32>
    %52 = vector.multi_reduction <add>, %48, %cst_28 [1] : vector<8x8xf32> to vector<8xf32>
    %53 = vector.shape_cast %52 : vector<8xf32> to vector<8x1xf32>
    %54 = arith.addf %51, %53 : vector<8x1xf32>
    %c1_29 = arith.constant 1 : index
    %c0_30 = arith.constant 0 : index
    %c0_31 = arith.constant 0 : index
    %55 = vector.load %arg8[%c1_29, %c0_30, %c0_31] : memref<4x8x1xf32, #tpu.memory_space<vmem>>, vector<1x8x1xf32>
    %56 = vector.shape_cast %55 : vector<1x8x1xf32> to vector<8x1xf32>
    %57 = vector.shape_cast %54 : vector<8x1xf32> to vector<1x8x1xf32>
    tpu.vector_store %arg8[%c1_29, %c0_30, %c0_31], %57 {strides = array<i32>} : memref<4x8x1xf32, #tpu.memory_space<vmem>>, vector<1x8x1xf32>,
    %c1_32 = arith.constant 1 : index
    %c0_33 = arith.constant 0 : index
    %c0_34 = arith.constant 0 : index
    %58 = vector.load %arg7[%c1_32, %c0_33, %c0_34] : memref<4x8x1xf32, #tpu.memory_space<vmem>>, vector<1x8x1xf32>
    %59 = vector.shape_cast %58 : vector<1x8x1xf32> to vector<8x1xf32>
    %60 = vector.shape_cast %43 : vector<8x1xf32> to vector<1x8x1xf32>
    tpu.vector_store %arg7[%c1_32, %c0_33, %c0_34], %60 {strides = array<i32>} : memref<4x8x1xf32, #tpu.memory_space<vmem>>, vector<1x8x1xf32>,
    %61 = arith.truncf %48 : vector<8x8xf32> to vector<8x8xbf16>
    %62 = vector.extract_strided_slice %5 {offsets = [0, 32], sizes = [8, 32], strides = [1, 1]} : vector<8x128xbf16> to vector<8x32xbf16>
    %cst_35 = arith.constant dense<0.000000e+00> : vector<8x32xf32>
    %63 = tpu.matmul %61, %62, %cst_35 {dimension_numbers = #tpu.dot_dimension_numbers<[1], [0], [0], [1], [0, 0, 1, 1], [], []>} : vector<8x8xbf16>, vector<8x32xbf16>, vector<8x32xf32> -> vector<8x32xf32>
    %64 = vector.shape_cast %45 : vector<8x1xf32> to vector<8x1xf32>
    %65 = vector.broadcast %64 : vector<8x1xf32> to vector<8x32xf32>
    %66 = vector.extract_strided_slice %3 {offsets = [0, 64], sizes = [8, 32], strides = [1, 1]} : vector<8x128xbf16> to vector<8x32xbf16>
    %67 = vector.extract_strided_slice %4 {offsets = [0, 64], sizes = [8, 32], strides = [1, 1]} : vector<8x128xbf16> to vector<8x32xbf16>
    %cst_36 = arith.constant dense<0.000000e+00> : vector<8x8xf32>
    %68 = tpu.matmul %66, %67, %cst_36 {dimension_numbers = #tpu.dot_dimension_numbers<[1], [1], [0], [0], [0, 0, 1, 0], [], []>} : vector<8x32xbf16>, vector<8x32xbf16>, vector<8x8xf32> -> vector<8x8xf32>
    %c2 = arith.constant 2 : index
    %c0_37 = arith.constant 0 : index
    %c0_38 = arith.constant 0 : index
    %69 = vector.load %arg7[%c2, %c0_37, %c0_38] : memref<4x8x1xf32, #tpu.memory_space<vmem>>, vector<1x8x1xf32>
    %70 = vector.shape_cast %69 : vector<1x8x1xf32> to vector<8x1xf32>
    %cst_39 = arith.constant dense<0xFF800000> : vector<8xf32>
    %71 = vector.multi_reduction <maximumf>, %68, %cst_39 [1] : vector<8x8xf32> to vector<8xf32>
    %72 = vector.shape_cast %71 : vector<8xf32> to vector<8x1xf32>
    %73 = arith.maximumf %70, %72 : vector<8x1xf32>
    %74 = arith.subf %70, %73 : vector<8x1xf32>
    %75 = math.exp %74 : vector<8x1xf32>
    %76 = vector.broadcast %73 : vector<8x1xf32> to vector<8x8xf32>
    %77 = arith.subf %68, %76 : vector<8x8xf32>
    %78 = math.exp %77 : vector<8x8xf32>
    %c2_40 = arith.constant 2 : index
    %c0_41 = arith.constant 0 : index
    %c0_42 = arith.constant 0 : index
    %79 = vector.load %arg8[%c2_40, %c0_41, %c0_42] : memref<4x8x1xf32, #tpu.memory_space<vmem>>, vector<1x8x1xf32>
    %80 = vector.shape_cast %79 : vector<1x8x1xf32> to vector<8x1xf32>
    %81 = arith.mulf %75, %80 : vector<8x1xf32>
    %cst_43 = arith.constant dense<0.000000e+00> : vector<8xf32>
    %82 = vector.multi_reduction <add>, %78, %cst_43 [1] : vector<8x8xf32> to vector<8xf32>
    %83 = vector.shape_cast %82 : vector<8xf32> to vector<8x1xf32>
    %84 = arith.addf %81, %83 : vector<8x1xf32>
    %c2_44 = arith.constant 2 : index
    %c0_45 = arith.constant 0 : index
    %c0_46 = arith.constant 0 : index
    %85 = vector.load %arg8[%c2_44, %c0_45, %c0_46] : memref<4x8x1xf32, #tpu.memory_space<vmem>>, vector<1x8x1xf32>
    %86 = vector.shape_cast %85 : vector<1x8x1xf32> to vector<8x1xf32>
    %87 = vector.shape_cast %84 : vector<8x1xf32> to vector<1x8x1xf32>
    tpu.vector_store %arg8[%c2_44, %c0_45, %c0_46], %87 {strides = array<i32>} : memref<4x8x1xf32, #tpu.memory_space<vmem>>, vector<1x8x1xf32>,
    %c2_47 = arith.constant 2 : index
    %c0_48 = arith.constant 0 : index
    %c0_49 = arith.constant 0 : index
    %88 = vector.load %arg7[%c2_47, %c0_48, %c0_49] : memref<4x8x1xf32, #tpu.memory_space<vmem>>, vector<1x8x1xf32>
    %89 = vector.shape_cast %88 : vector<1x8x1xf32> to vector<8x1xf32>
    %90 = vector.shape_cast %73 : vector<8x1xf32> to vector<1x8x1xf32>
    tpu.vector_store %arg7[%c2_47, %c0_48, %c0_49], %90 {strides = array<i32>} : memref<4x8x1xf32, #tpu.memory_space<vmem>>, vector<1x8x1xf32>,
    %91 = arith.truncf %78 : vector<8x8xf32> to vector<8x8xbf16>
    %92 = vector.extract_strided_slice %5 {offsets = [0, 64], sizes = [8, 32], strides = [1, 1]} : vector<8x128xbf16> to vector<8x32xbf16>
    %cst_50 = arith.constant dense<0.000000e+00> : vector<8x32xf32>
    %93 = tpu.matmul %91, %92, %cst_50 {dimension_numbers = #tpu.dot_dimension_numbers<[1], [0], [0], [1], [0, 0, 1, 1], [], []>} : vector<8x8xbf16>, vector<8x32xbf16>, vector<8x32xf32> -> vector<8x32xf32>
    %94 = vector.shape_cast %75 : vector<8x1xf32> to vector<8x1xf32>
    %95 = vector.broadcast %94 : vector<8x1xf32> to vector<8x32xf32>
    %96 = vector.extract_strided_slice %3 {offsets = [0, 96], sizes = [8, 32], strides = [1, 1]} : vector<8x128xbf16> to vector<8x32xbf16>
    %97 = vector.extract_strided_slice %4 {offsets = [0, 96], sizes = [8, 32], strides = [1, 1]} : vector<8x128xbf16> to vector<8x32xbf16>
    %cst_51 = arith.constant dense<0.000000e+00> : vector<8x8xf32>
    %98 = tpu.matmul %96, %97, %cst_51 {dimension_numbers = #tpu.dot_dimension_numbers<[1], [1], [0], [0], [0, 0, 1, 0], [], []>} : vector<8x32xbf16>, vector<8x32xbf16>, vector<8x8xf32> -> vector<8x8xf32>
    %c3 = arith.constant 3 : index
    %c0_52 = arith.constant 0 : index
    %c0_53 = arith.constant 0 : index
    %99 = vector.load %arg7[%c3, %c0_52, %c0_53] : memref<4x8x1xf32, #tpu.memory_space<vmem>>, vector<1x8x1xf32>
    %100 = vector.shape_cast %99 : vector<1x8x1xf32> to vector<8x1xf32>
    %cst_54 = arith.constant dense<0xFF800000> : vector<8xf32>
    %101 = vector.multi_reduction <maximumf>, %98, %cst_54 [1] : vector<8x8xf32> to vector<8xf32>
    %102 = vector.shape_cast %101 : vector<8xf32> to vector<8x1xf32>
    %103 = arith.maximumf %100, %102 : vector<8x1xf32>
    %104 = arith.subf %100, %103 : vector<8x1xf32>
    %105 = math.exp %104 : vector<8x1xf32>
    %106 = vector.broadcast %103 : vector<8x1xf32> to vector<8x8xf32>
    %107 = arith.subf %98, %106 : vector<8x8xf32>
    %108 = math.exp %107 : vector<8x8xf32>
    %c3_55 = arith.constant 3 : index
    %c0_56 = arith.constant 0 : index
    %c0_57 = arith.constant 0 : index
    %109 = vector.load %arg8[%c3_55, %c0_56, %c0_57] : memref<4x8x1xf32, #tpu.memory_space<vmem>>, vector<1x8x1xf32>
    %110 = vector.shape_cast %109 : vector<1x8x1xf32> to vector<8x1xf32>
    %111 = arith.mulf %105, %110 : vector<8x1xf32>
    %cst_58 = arith.constant dense<0.000000e+00> : vector<8xf32>
    %112 = vector.multi_reduction <add>, %108, %cst_58 [1] : vector<8x8xf32> to vector<8xf32>
    %113 = vector.shape_cast %112 : vector<8xf32> to vector<8x1xf32>
    %114 = arith.addf %111, %113 : vector<8x1xf32>
    %c3_59 = arith.constant 3 : index
    %c0_60 = arith.constant 0 : index
    %c0_61 = arith.constant 0 : index
    %115 = vector.load %arg8[%c3_59, %c0_60, %c0_61] : memref<4x8x1xf32, #tpu.memory_space<vmem>>, vector<1x8x1xf32>
    %116 = vector.shape_cast %115 : vector<1x8x1xf32> to vector<8x1xf32>
    %117 = vector.shape_cast %114 : vector<8x1xf32> to vector<1x8x1xf32>
    tpu.vector_store %arg8[%c3_59, %c0_60, %c0_61], %117 {strides = array<i32>} : memref<4x8x1xf32, #tpu.memory_space<vmem>>, vector<1x8x1xf32>,
    %c3_62 = arith.constant 3 : index
    %c0_63 = arith.constant 0 : index
    %c0_64 = arith.constant 0 : index
    %118 = vector.load %arg7[%c3_62, %c0_63, %c0_64] : memref<4x8x1xf32, #tpu.memory_space<vmem>>, vector<1x8x1xf32>
    %119 = vector.shape_cast %118 : vector<1x8x1xf32> to vector<8x1xf32>
    %120 = vector.shape_cast %103 : vector<8x1xf32> to vector<1x8x1xf32>
    tpu.vector_store %arg7[%c3_62, %c0_63, %c0_64], %120 {strides = array<i32>} : memref<4x8x1xf32, #tpu.memory_space<vmem>>, vector<1x8x1xf32>,
    %121 = arith.truncf %108 : vector<8x8xf32> to vector<8x8xbf16>
    %122 = vector.extract_strided_slice %5 {offsets = [0, 96], sizes = [8, 32], strides = [1, 1]} : vector<8x128xbf16> to vector<8x32xbf16>
    %cst_65 = arith.constant dense<0.000000e+00> : vector<8x32xf32>
    %123 = tpu.matmul %121, %122, %cst_65 {dimension_numbers = #tpu.dot_dimension_numbers<[1], [0], [0], [1], [0, 0, 1, 1], [], []>} : vector<8x8xbf16>, vector<8x32xbf16>, vector<8x32xf32> -> vector<8x32xf32>
    %124 = vector.shape_cast %105 : vector<8x1xf32> to vector<8x1xf32>
    %125 = vector.broadcast %124 : vector<8x1xf32> to vector<8x32xf32>
    %126 = tpu.concatenate %33, %63, %93, %123 in 1 : vector<8x32xf32>, vector<8x32xf32>, vector<8x32xf32>, vector<8x32xf32> -> vector<8x128xf32>
    %127 = tpu.concatenate %35, %65, %95, %125 in 1 : vector<8x32xf32>, vector<8x32xf32>, vector<8x32xf32>, vector<8x32xf32> -> vector<8x128xf32>
    %c0_66 = arith.constant 0 : index
    %c0_67 = arith.constant 0 : index
    %128 = vector.load %arg9[%c0_66, %c0_67] : memref<8x128xf32, #tpu.memory_space<vmem>>, vector<8x128xf32>
    %129 = arith.mulf %127, %128 : vector<8x128xf32>
    %130 = arith.addf %129, %126 : vector<8x128xf32>
    %c0_68 = arith.constant 0 : index
    %c0_69 = arith.constant 0 : index
    %131 = vector.load %arg9[%c0_68, %c0_69] : memref<8x128xf32, #tpu.memory_space<vmem>>, vector<8x128xf32>
    tpu.vector_store %arg9[%c0_68, %c0_69], %130 {strides = array<i32>} : memref<8x128xf32, #tpu.memory_space<vmem>>, vector<8x128xf32>,
    %c0_i32_70 = arith.constant 0 : i32
    %132 = arith.cmpi eq, %arg2, %c0_i32_70 : i32
    %133 = arith.extui %132 : i1 to i32
    %c0_i32_71 = arith.constant 0 : i32
    %134 = arith.cmpi ne, %133, %c0_i32_71 : i32
    scf.if %134 {
      %c0_72 = arith.constant 0 : index
      %c0_73 = arith.constant 0 : index
      %c0_74 = arith.constant 0 : index
      %135 = vector.load %arg8[%c0_72, %c0_73, %c0_74] : memref<4x8x1xf32, #tpu.memory_space<vmem>>, vector<1x8x1xf32>
      %136 = vector.shape_cast %135 : vector<1x8x1xf32> to vector<8x1xf32>
      %137 = tpu.reciprocal %136 : vector<8x1xf32> -> vector<8x1xf32>
      %138 = vector.shape_cast %137 : vector<8x1xf32> to vector<8x1xf32>
      %139 = vector.broadcast %138 : vector<8x1xf32> to vector<8x32xf32>
      %c1_75 = arith.constant 1 : index
      %c0_76 = arith.constant 0 : index
      %c0_77 = arith.constant 0 : index
      %140 = vector.load %arg8[%c1_75, %c0_76, %c0_77] : memref<4x8x1xf32, #tpu.memory_space<vmem>>, vector<1x8x1xf32>
      %141 = vector.shape_cast %140 : vector<1x8x1xf32> to vector<8x1xf32>
      %142 = tpu.reciprocal %141 : vector<8x1xf32> -> vector<8x1xf32>
      %143 = vector.shape_cast %142 : vector<8x1xf32> to vector<8x1xf32>
      %144 = vector.broadcast %143 : vector<8x1xf32> to vector<8x32xf32>
      %c2_78 = arith.constant 2 : index
      %c0_79 = arith.constant 0 : index
      %c0_80 = arith.constant 0 : index
      %145 = vector.load %arg8[%c2_78, %c0_79, %c0_80] : memref<4x8x1xf32, #tpu.memory_space<vmem>>, vector<1x8x1xf32>
      %146 = vector.shape_cast %145 : vector<1x8x1xf32> to vector<8x1xf32>
      %147 = tpu.reciprocal %146 : vector<8x1xf32> -> vector<8x1xf32>
      %148 = vector.shape_cast %147 : vector<8x1xf32> to vector<8x1xf32>
      %149 = vector.broadcast %148 : vector<8x1xf32> to vector<8x32xf32>
      %c3_81 = arith.constant 3 : index
      %c0_82 = arith.constant 0 : index
      %c0_83 = arith.constant 0 : index
      %150 = vector.load %arg8[%c3_81, %c0_82, %c0_83] : memref<4x8x1xf32, #tpu.memory_space<vmem>>, vector<1x8x1xf32>
      %151 = vector.shape_cast %150 : vector<1x8x1xf32> to vector<8x1xf32>
      %152 = tpu.reciprocal %151 : vector<8x1xf32> -> vector<8x1xf32>
      %153 = vector.shape_cast %152 : vector<8x1xf32> to vector<8x1xf32>
      %154 = vector.broadcast %153 : vector<8x1xf32> to vector<8x32xf32>
      %155 = tpu.concatenate %139, %144, %149, %154 in 1 : vector<8x32xf32>, vector<8x32xf32>, vector<8x32xf32>, vector<8x32xf32> -> vector<8x128xf32>
      %c0_84 = arith.constant 0 : index
      %c0_85 = arith.constant 0 : index
      %156 = vector.load %arg9[%c0_84, %c0_85] : memref<8x128xf32, #tpu.memory_space<vmem>>, vector<8x128xf32>
      %157 = arith.mulf %156, %155 : vector<8x128xf32>
      %158 = arith.truncf %157 : vector<8x128xf32> to vector<8x128xbf16>
      %c0_86 = arith.constant 0 : index
      %c0_87 = arith.constant 0 : index
      %159 = vector.load %arg6[%c0_86, %c0_87] : memref<8x128xbf16, #tpu.memory_space<vmem>>, vector<8x128xbf16>
      tpu.vector_store %arg6[%c0_86, %c0_87], %158 {strides = array<i32>} : memref<8x128xbf16, #tpu.memory_space<vmem>>, vector<8x128xbf16>,
    } else {
    }
    return
  }
  func.func @transform_0(%arg0: i32, %arg1: i32, %arg2: i32) -> (i32, i32) {
    %c0_i32 = arith.constant 0 : i32
    return %arg1, %arg0 : i32, i32
  }
  func.func @transform_1(%arg0: i32, %arg1: i32, %arg2: i32) -> (i32, i32) {
    %c0_i32 = arith.constant 0 : i32
    return %arg2, %arg0 : i32, i32
  }
  func.func @transform_2(%arg0: i32, %arg1: i32, %arg2: i32) -> (i32, i32) {
    %c0_i32 = arith.constant 0 : i32
    return %arg2, %arg0 : i32, i32
  }
  func.func @transform_3(%arg0: i32, %arg1: i32, %arg2: i32) -> (i32, i32) {
    %c0_i32 = arith.constant 0 : i32
    return %arg1, %arg0 : i32, i32
  }
}

</mosaic_0001>

<bundles_post_ra>
// kernel: multihead_attention.7
= control target key start
LH: loop header
LB: loop body
LE: loop exit
PB: predicated region body
PF: predicated region fallthrough
CT: control target
= control target key end

     0   :  { %v164_v0 = vmov 0.0   ;;  %vm165_vm0 = vmmov 0   ;;  %s246_s1 = inlined_call_operand.vmem [shape: f32[128,128], index: 1, kind: input, shape index: {}]   ;;  %s247_s0 = inlined_call_operand.vmem [shape: f32[16,128], index: 0, kind: input, shape index: {}]   ;;  %s248_s2 = inlined_call_operand.vmem [shape: f32[1,128], index: 2, kind: input, shape index: {}]   ;;  %s249_s3 = inlined_call_operand.vmem [shape: bf16[16,128], index: 3, kind: output, shape index: {}]  }
   0x1   :  { %142 = vmatprep.subr.bf16.mxu0 %v164_v0  ;;  %v26_v1 = vld [vmem:[%s246_s1] sm:$0xff]  ;;  %v27_v2 = vld [vmem:[%s246_s1 + $0x8] sm:$0xff]  ;;  %158 = vmatprep.mubr.msk.bf16.mxu0 %vm165_vm0, %v164_v0  ;;  %v28_v4 = vld [vmem:[%s246_s1 + $0x10] sm:$0xff] }
   0x2   :  { %v42_v3 = vpack.c.bf16 %v27_v2, %v26_v1  ;;  %v29_v5 = vld [vmem:[%s246_s1 + $0x18] sm:$0xff]  ;;  %v30_v7 = vld [vmem:[%s246_s1 + $0x20] sm:$0xff]  ;;  %v31_v8 = vld [vmem:[%s246_s1 + $0x28] sm:$0xff] }
   0x3   :  { %v43_v6 = vpack.c.bf16 %v29_v5, %v28_v4  ;;  %v44_v9 = vpack.c.bf16 %v31_v8, %v30_v7  ;;  %v32_v10 = vld [vmem:[%s246_s1 + $0x30] sm:$0xff]  ;;  %v33_v11 = vld [vmem:[%s246_s1 + $0x38] sm:$0xff]  ;;  %v34_v13 = vld [vmem:[%s246_s1 + $0x40] sm:$0xff] }
   0x4   :  { %143 = vmatpush3.bf16.xpose.msra.mxu0 %v42_v3  ;;  %v45_v12 = vpack.c.bf16 %v33_v11, %v32_v10  ;;  %v35_v14 = vld [vmem:[%s246_s1 + $0x48] sm:$0xff]  ;;  %v36_v16 = vld [vmem:[%s246_s1 + $0x50] sm:$0xff]  ;;  %v37_v17 = vld [vmem:[%s246_s1 + $0x58] sm:$0xff] }
   0x5   :  { %144 = vmatprep.subr.bf16.mxu0 %v164_v0  ;;  %v46_v15 = vpack.c.bf16 %v35_v14, %v34_v13  ;;  %v47_v18 = vpack.c.bf16 %v37_v17, %v36_v16  ;;  %v38_v19 = vld [vmem:[%s246_s1 + $0x60] sm:$0xff]  ;;  %v39_v20 = vld [vmem:[%s246_s1 + $0x68] sm:$0xff]  ;;  %v40_v22 = vld [vmem:[%s246_s1 + $0x70] sm:$0xff] }
   0x6   :  { %v48_v21 = vpack.c.bf16 %v39_v20, %v38_v19  ;;  %v41_v23 = vld [vmem:[%s246_s1 + $0x78] sm:$0xff]  ;;  %v23_v25 = vld [vmem:[%s247_s0] sm:$0xff]  ;;  %v24_v26 = vld [vmem:[%s247_s0 + $0x8] sm:$0xff] }
   0x7   :  { %v49_v24 = vpack.c.bf16 %v41_v23, %v40_v22  ;;  %v25_v27 = vpack.c.bf16 %v24_v26, %v23_v25  ;;  %v123_v29 = vld [vmem:[%s248_s2] ss:$0 sm:$0xff] }
   0xc   :  { %145 = vmatpush3.bf16.xpose.msra.mxu0 %v43_v6 }
   0xd   :  { %146 = vmatprep.subr.bf16.mxu0 %v164_v0 }
  0x14   :  { %147 = vmatpush3.bf16.xpose.msra.mxu0 %v44_v9 }
  0x15   :  { %148 = vmatprep.subr.bf16.mxu0 %v164_v0 }
  0x1c   :  { %149 = vmatpush3.bf16.xpose.msra.mxu0 %v45_v12 }
  0x1d   :  { %150 = vmatprep.subr.bf16.mxu0 %v164_v0 }
  0x24   :  { %151 = vmatpush3.bf16.xpose.msra.mxu0 %v46_v15 }
  0x25   :  { %152 = vmatprep.subr.bf16.mxu0 %v164_v0 }
  0x2c   :  { %153 = vmatpush3.bf16.xpose.msra.mxu0 %v47_v18 }
  0x2d   :  { %154 = vmatprep.subr.bf16.mxu0 %v164_v0 }
  0x34   :  { %155 = vmatpush3.bf16.xpose.msra.mxu0 %v48_v21 }
  0x35   :  { %156 = vmatprep.subr.bf16.mxu0 %v164_v0 }
  0x3c   :  { %157 = vmatpush3.bf16.xpose.msra.mxu0 %v49_v24 }
  0x43   :  { %159 = vmatmul.mubr.bf16.vlgmr.msra.gmra.mrb[0].mxu0 %v25_v27 }
 0x116   :  { %v84_v28 = vpop.f32.mrb[0].mxu0 }
 0x117   :  { %v160_v30 = vpop.f32.mrb[1].mxu0  ;;  %v107_v32 = vadd.f32 %v123_v29, %v84_v28 }
 0x118   :  { %v87_v31 = vpop.f32.mrb[2].mxu0 }
 0x119   :  { %v108_v33 = vadd.f32 %v123_v29, %v87_v31  ;;  %v161_v34 = vpop.f32.mrb[3].mxu0 }
 0x11b   :  { %v131_v35 = vpack.c.bf16 %v108_v33, %v107_v32 }
 0x11d   :  { %132 = vst [vmem:[%s249_s3] sm:$0xff] %v131_v35  }

// kernel: multihead_attention.9
= control target key start
LH: loop header
LB: loop body
LE: loop exit
PB: predicated region body
PF: predicated region fallthrough
CT: control target
= control target key end

     0   :  { %v194_v2 = vmov 0.0   ;;  %vm195_vm0 = vmmov 0   ;;  %s285_s0 = inlined_call_operand.vmem [shape: bf16[16,128], index: 0, kind: input, shape index: {}]   ;;  %s286_s1 = inlined_call_operand.vmem [shape: f32[128,128], index: 1, kind: input, shape index: {}]   ;;  %s287_s2 = inlined_call_operand.vmem [shape: f32[1,128], index: 2, kind: input, shape index: {}]   ;;  %s288_s3 = inlined_call_operand.hbm [shape: f32[16,128], index: 3, kind: output, shape index: {}]  }
   0x1   :  { %v26_v0 = vld [vmem:[%s286_s1] sm:$0xff]  ;;  %v27_v1 = vld [vmem:[%s286_s1 + $0x8] sm:$0xff]  ;;  %144 = vmatprep.subr.bf16.mxu0 %v194_v2  ;;  %160 = vmatprep.mubr.msk.bf16.mxu0 %vm195_vm0, %v194_v2  ;;  %v28_v4 = vld [vmem:[%s286_s1 + $0x10] sm:$0xff] }
   0x2   :  { %v42_v3 = vpack.c.bf16 %v27_v1, %v26_v0  ;;  %v29_v5 = vld [vmem:[%s286_s1 + $0x18] sm:$0xff] }
   0x4   :  { %145 = vmatpush3.bf16.xpose.msra.mxu0 %v42_v3 }
   0x5   :  { %146 = vmatprep.subr.bf16.mxu0 %v194_v2 }
   0x6   :  { %8 = vsyncpa [#allocation4], 0  ;;  %v43_v6 = vpack.c.bf16 %v29_v5, %v28_v4  ;;  %v30_v7 = vld [vmem:[%s286_s1 + $0x20] sm:$0xff]  ;;  %v31_v8 = vld [vmem:[%s286_s1 + $0x28] sm:$0xff]  ;;  %s196_s21 = smov [#allocation3]  }
   0x7   :  { %v44_v9 = vpack.c.bf16 %v31_v8, %v30_v7  ;;  %v32_v10 = vld [vmem:[%s286_s1 + $0x30] sm:$0xff]  ;;  %v33_v11 = vld [vmem:[%s286_s1 + $0x38] sm:$0xff]  ;;  %v34_v13 = vld [vmem:[%s286_s1 + $0x40] sm:$0xff]  ;;  %s122_s22 = sshll.u32 %s196_s21, 4  ;;  %s123_s22 = int_to_ptr.vmem [resolvable:$true] %s122_s22 }
   0x8   :  { %v45_v12 = vpack.c.bf16 %v33_v11, %v32_v10  ;;  %v35_v14 = vld [vmem:[%s286_s1 + $0x48] sm:$0xff]  ;;  %v36_v16 = vld [vmem:[%s286_s1 + $0x50] sm:$0xff]  ;;  %v37_v17 = vld [vmem:[%s286_s1 + $0x58] sm:$0xff]  ;;  %p175_p1 = scmp.lt.s32.totalorder %s123_s22, %s123_s22 }
   0x9   :  { %v46_v15 = vpack.c.bf16 %v35_v14, %v34_v13  ;;  %v47_v18 = vpack.c.bf16 %v37_v17, %v36_v16  ;;  %v38_v19 = vld [vmem:[%s286_s1 + $0x60] sm:$0xff]  ;;  %v39_v20 = vld [vmem:[%s286_s1 + $0x68] sm:$0xff]  ;;  %v40_v22 = vld [vmem:[%s286_s1 + $0x70] sm:$0xff] }
   0xa   :  { %v48_v21 = vpack.c.bf16 %v39_v20, %v38_v19  ;;  %v41_v23 = vld [vmem:[%s286_s1 + $0x78] sm:$0xff]  ;;  %v169_v25 = vld [vmem:[%s285_s0] sm:$0xff]   ;;  %s170_s1 = scalar_lea.vmem %s123_s22, 256 }
   0xb   :  { %v49_v24 = vpack.c.bf16 %v41_v23, %v40_v22  ;;  %v134_v26 = vld [vmem:[%s287_s2] ss:$0 sm:$0xff]  ;;  %p171_p0 = scmp.ne.s32.totalorder %s123_s22, %s170_s1  ;;  %p176_p2 = scmp.lt.s32.totalorder %s170_s1, %s170_s1 }
   0xc   :  { %147 = vmatpush3.bf16.xpose.msra.mxu0 %v43_v6 }
   0xd   :  { %148 = vmatprep.subr.bf16.mxu0 %v194_v2  ;;  %p177_p3 = por %p176_p2, %p175_p1 }
   0xf   :  { %p178_p4 = pnand %p177_p3, %p171_p0 }
  0x14   :  { %149 = vmatpush3.bf16.xpose.msra.mxu0 %v44_v9 }
  0x15   :  { %150 = vmatprep.subr.bf16.mxu0 %v194_v2 }
  0x1c   :  { %151 = vmatpush3.bf16.xpose.msra.mxu0 %v45_v12 }
  0x1d   :  { %152 = vmatprep.subr.bf16.mxu0 %v194_v2 }
  0x24   :  { %153 = vmatpush3.bf16.xpose.msra.mxu0 %v46_v15 }
  0x25   :  { %154 = vmatprep.subr.bf16.mxu0 %v194_v2 }
  0x2c   :  { %155 = vmatpush3.bf16.xpose.msra.mxu0 %v47_v18 }
  0x2d   :  { %156 = vmatprep.subr.bf16.mxu0 %v194_v2 }
  0x34   :  { %157 = vmatpush3.bf16.xpose.msra.mxu0 %v48_v21 }
  0x35   :  { %158 = vmatprep.subr.bf16.mxu0 %v194_v2 }
  0x3c   :  { %159 = vmatpush3.bf16.xpose.msra.mxu0 %v49_v24 }
  0x43   :  { %161 = vmatmul.mubr.bf16.vlgmr.msra.gmra.mrb[0].mxu0 %v169_v25 }
 0x116   :  { %v90_v27 = vpop.f32.mrb[0].mxu0 }
 0x117   :  { %v113_v28 = vadd.f32 %v134_v26, %v90_v27  ;;  %v162_v29 = vpop.f32.mrb[1].mxu0 }
 0x118   :  { %v93_v30 = vpop.f32.mrb[2].mxu0 }
 0x119   :  { %115 = vst [vmem:[#allocation3] sm:$0xff] %v113_v28  ;;  %v114_v31 = vadd.f32 %v134_v26, %v93_v30  ;;  %v163_v32 = vpop.f32.mrb[3].mxu0 }
 0x11b   :  { %116 = vst [vmem:[#allocation3 + $0x8] sm:$0xff] %v114_v31 }
 0x11c   :  { %181 = shalt.err (!%p178_p4)
}
 0x11d   :  { %s182_s23 = scalar_lea.hbm %s288_s3, 256 }
 0x11e   :  { %p183_p5 = scmp.ne.s32.totalorder %s288_s3, %s182_s23  ;;  %p186_p6 = scmp.lt.u32.totalorder %s182_s23, %s288_s3 }
 0x120   :  { %p188_p7 = pnand %p186_p6, %p183_p5 }
 0x122   :  { %191 = shalt.err (!%p188_p7)
}
 0x123   :  { %s197_s28 = smov 128   ;;  %s198_s29 = smov 8  }
 0x124   :  { %128 = dma.vmem_to_hbm [thread:$0]  %s123_s22, 256, %s288_s3, [#allocation4], %s197_s28, %s197_s28, %s198_s29  }
 0x125   :  { %192 = dma.done.wait [#allocation4], 256  }
 0x126   :  { %193 = vsyncadd [#allocation4], 4294967040 }
 0x127   :  { %132 = vsyncpa [#allocation4], 1 }

// kernel: multihead_attention.8
= control target key start
LH: loop header
LB: loop body
LE: loop exit
PB: predicated region body
PF: predicated region fallthrough
CT: control target
= control target key end

     0   :  { %s1194_s12 = smov 0   ;;  %s1196_s13 = smov 0   ;;  %s1359_s0 = inlined_call_operand.vmem [shape: bf16[8,256], index: 0, kind: input, shape index: {}]   ;;  %s1360_s1 = inlined_call_operand.vmem [shape: bf16[8,256], index: 1, kind: input, shape index: {}]   ;;  %s1361_s2 = inlined_call_operand.vmem [shape: bf16[8,256], index: 2, kind: input, shape index: {}]   ;;  %s1362_s3 = inlined_call_operand.vmem [shape: bf16[8,256], index: 3, kind: output, shape index: {}]  }
   0x1   :  { %s1198_s14 = smov 0  }
   0x2 LB: > { %s32_s15 = sadd.s32 1, %s1161_s13  ;;  %p1002_p0 = scmp.ge.s32.totalorder %s1165_s14, 1  ;;  %s1165_s14 = sphi %s1198_s14, %s13_s14   ;;  %s1161_s13 = sphi %s1196_s13, %s1364_s13   ;;  %s1157_s12 = sphi %s1194_s12, %s1363_s12  }
   0x3   : > { %p34_p1 = scmp.ge.s32.totalorder %s32_s15, 2  ;;  %p193_p2 = scmp.lt.s32.totalorder %s1165_s14, 3 }
   0x5   : > { %s1366_s15 = smov (%p34_p1, %s32_s15), 0  ;;  %p194_p3 = pnand %p1002_p0, %p193_p2 }
   0x6   : > { %p241_p4 = scmp.lt.s32.totalorder (!%p194_p3), %s1157_s12, 1  ;;  %v1167_v0 = vmov (!%p194_p3), 0.0   ;;  %vm1168_vm0 = vmmov (!%p194_p3), 0   ;;  %vm289_vm1 = vcmask (!%p194_p3), 261120   ;;  %vm276_vm2 = vcmask (!%p194_p3), 7168   ;;  %s1171_s23 = smov (!%p194_p3), 96  }
   0x7   : > { %197 = sbr.rel (%p194_p3) target bundleno = 1411 (0x583), region = 32  ;;  %1036 = vmatprep.subr.bf16.mxu0 (!%p194_p3), %v1167_v0  ;;  %1038 = vmatprep.mubr.msk.bf16.mxu0 (!%p194_p3), %vm1168_vm0, %v1167_v0  ;;  %v1169_v4 = vmov (!%p194_p3), -inf   ;;  %281 = vst.msk [vmem:[#allocation3] sm:$0xff] (!%p194_p3), %vm276_vm2, %v1167_v0  ;;  %282 = vst.msk [vmem:[#allocation3 + $0x8] sm:$0xff] (!%p194_p3), %vm276_vm2, %v1167_v0  ;;  %vm337_vm3 = vcmask (!%p194_p3), 64512   ;;  %v1170_v10 = vmov (!%p194_p3), 0  }
   0x8   : > { %1042 = vmatprep.subr.bf16.mxu1 (!%p194_p3), %v1167_v0  ;;  %1044 = vmatprep.mubr.msk.bf16.mxu1 (!%p194_p3), %vm1168_vm0, %v1167_v0  ;;  %277 = vst.msk [vmem:[#allocation2] sm:$0xff] (!%p194_p3), %vm276_vm2, %v1169_v4  ;;  %278 = vst.msk [vmem:[#allocation2 + $0x8] sm:$0xff] (!%p194_p3), %vm276_vm2, %v1169_v4  ;;  %s1172_s24 = smov (!%p194_p3), 64   ;;  %s1173_s25 = smov (!%p194_p3), 32   ;;  %vm366_vm4 = vcmask (!%p194_p3), 1043456   ;;  %vm827_vm5 = vcmask (!%p194_p3), 523264  }
   0x9   : > { %279 = vst.msk [vmem:[#allocation2 + $0x10] sm:$0xff] (!%p194_p3), %vm276_vm2, %v1169_v4  ;;  %280 = vst.msk [vmem:[#allocation2 + $0x18] sm:$0xff] (!%p194_p3), %vm276_vm2, %v1169_v4  ;;  %1115 = vset.pattern.permute.xlu0 (!%p194_p3), %v1170_v10  ;;  %1116 = vset.pattern.permute.xlu1 (!%p194_p3), %v1170_v10  ;;  %vm829_vm6 = vcmask (!%p194_p3), 785408  }
   0xa   : > { %283 = vst.msk [vmem:[#allocation3 + $0x10] sm:$0xff] (!%p194_p3), %vm276_vm2, %v1167_v0  ;;  %284 = vst.msk [vmem:[#allocation3 + $0x18] sm:$0xff] (!%p194_p3), %vm276_vm2, %v1167_v0 }
   0xe   : > { %s1368_s12 = smov (!%p241_p4, %s1157_s12), 1 }
   0xf   : > { %s1218_s16 = sshll.u32 %s1368_s12, 2  ;;  %v1252_v13 = vld [vmem:[#allocation2] sm:$0xff]  ;;  %v472_v52 = vld [vmem:[#allocation2 + $0x8] sm:$0xff] }
  0x10   : > { %s254_s19 = scalar_lea.vmem %s1360_s1, %s1218_s16  ;;  %s246_s22 = scalar_lea.vmem %s1359_s0, %s1218_s16  ;;  %v1296_v56 = vld [vmem:[#allocation2 + $0x10] sm:$0xff]  ;;  %v735_v60 = vld [vmem:[#allocation2 + $0x18] sm:$0xff] }
  0x11   : > { %v287_v1 = vld [vmem:[%s254_s19] sm:$0xf]  ;;  %s262_s28 = scalar_lea.vmem %s1361_s2, %s1218_s16  ;;  %s270_s4 = scalar_lea.vmem %s1362_s3, %s1218_s16 }
  0x12   : > { %v294_v2 = vsel %vm289_vm1, %v287_v1, 0  ;;  %v286_v3 = vld [vmem:[%s246_s22] sm:$0xf]  ;;  %v1010_v11 = vcombine.low %v287_v1, %v287_v1 }
  0x13   : > { %1037 = vmatpush3.bf16.xpose.msra.mxu0 %v294_v2  ;;  %v1009_v12 = vcombine.low %v286_v3, %v286_v3  ;;  %v1266_v17 = vld [vmem:[%s262_s28] sm:$0xf] }
  0x14   : > { %1054 = vmatprep.subr.bf16.mxu0 %v1167_v0  ;;  %423 = vrot.lane.b32.xlu1 %v1010_v11, %s1171_s23  ;;  %v368_v18 = vsel %vm366_vm4, %v1266_v17, 0  ;;  %v1012_v63 = vcombine.low %v1266_v17, %v1266_v17 }
  0x15   : > { %1043 = vmatpush3.bf16.msra.mxu1 %v368_v18 }
  0x16   : > { %1048 = vmatprep.subr.bf16.mxu1 %v1167_v0 }
  0x18   : > { %418 = vrot.lane.b32.xlu1 %v1009_v12, %s1171_s23 }
  0x1a   : > { %1039 = vmatmul.mubr.msk.bf16.vlgmr.msra.gmra.mrb[0].mxu0 %vm289_vm1, %v286_v3 }
  0x1b   : > { %1056 = vmatprep.mubr.msk.bf16.mxu0 %vm1168_vm0, %v1167_v0 }
  0x1c   : > { %556 = vrot.lane.b32.xlu1 %v1010_v11, %s1172_s24 }
  0x20   : > { %554 = vrot.lane.b32.xlu1 %v1009_v12, %s1172_s24 }
  0x24   : > { %686 = vrot.lane.b32.xlu1 %v1010_v11, %s1173_s25 }
  0x28   : > { %684 = vrot.lane.b32.xlu1 %v1009_v12, %s1173_s25 }
  0x86   : > { %v424_v22 = vpop.permute.xlu1 %423 }
  0x87   : > { %v429_v25 = vsel %vm289_vm1, %v424_v22, 0 }
  0x8a   : > { %v419_v23 = vpop.permute.xlu1 %418 }
  0x8e   : > { %v557_v27 = vpop.permute.xlu1 %556 }
  0x8f   : > { %v562_v29 = vsel %vm289_vm1, %v557_v27, 0 }
  0x92   : > { %v555_v28 = vpop.permute.xlu1 %554 }
  0x96   : > { %v687_v30 = vpop.permute.xlu1 %686 }
  0x97   : > { %v692_v31 = vsel %vm289_vm1, %v687_v30, 0 }
  0x9a   : > { %v685_v32 = vpop.permute.xlu1 %684 }
  0xed   : > { %v330_v5 = vpop.f32.mrb[0].mxu0 }
  0xee   : > { %v1040_v6 = vpop.f32.mrb[1].mxu0  ;;  %v338_v7 = vsel %vm337_vm3, %v330_v5, -inf }
  0xef   : > { %339 = vmax.xlane.f32.xlu0 %v338_v7  ;;  %v333_v8 = vpop.f32.mrb[2].mxu0 }
  0xf0   : > { %v1041_v9 = vpop.f32.mrb[3].mxu0 }
 0x17c   : > { %v340_v14 = vpop.xlane.xlu0 %339 }
 0x17d   : > { %v1255_v15 = vmax.f32 %v1252_v13, %v340_v14 }
 0x17f   : > { %v342_v16 = vsub.f32 %v1252_v13, %v1255_v15  ;;  %361 = vst.msk [vmem:[#allocation2] sm:$0xff] %vm276_vm2, %v1255_v15  ;;  %347 = vperm.xlu0 %1115, %v1255_v15  }
 0x1fe   : > { %v348_v19 = vpop.permute.xlu0 %347 }
 0x1ff   : > { %v350_v20 = vsub.f32 %v330_v5, %v348_v19 }
 0x201   : > { %v351_v21 = vmul.f32 1.442695, %v350_v20 }
 0x203   : > { %1119 = vpow2.f32 %v351_v21 }
 0x20d   : > { %v1271_v24 = vpop.eup %1119 }
 0x20e   : > { %v362_v26 = vpack.c.bf16 %v1271_v24, %v1271_v24  ;;  %v355_v2 = vsel %vm337_vm3, %v1271_v24, 0.0 }
 0x210   : > { %1045 = vmatmul.mubr.msk.bf16.vlgmr.msra.gmra.mrb[0].mxu1 %vm337_vm3, %v362_v26 }
 0x211   : > { %1049 = vmatpush3.bf16.xpose.msra.mxu1 %v429_v25  ;;  %1050 = vmatprep.mubr.msk.bf16.mxu1 %vm1168_vm0, %v1167_v0 }
 0x212   : > { %1060 = vmatprep.subr.bf16.mxu1 %v1167_v0 }
 0x218   : > { %1051 = vmatmul.mubr.msk.bf16.vlgmr.msra.gmra.mrb[4].mxu1 %vm289_vm1, %v419_v23 }
 0x219   : > { %1061 = vmatpush3.bf16.xpose.msra.mxu1 %v562_v29  ;;  %1062 = vmatprep.mubr.msk.bf16.mxu1 %vm1168_vm0, %v1167_v0 }
 0x21a   : > { %1072 = vmatprep.subr.bf16.mxu1 %v1167_v0 }
 0x220   : > { %1063 = vmatmul.mubr.msk.bf16.vlgmr.msra.gmra.mrb[8].mxu1 %vm289_vm1, %v555_v28 }
 0x221   : > { %1073 = vmatpush3.bf16.xpose.msra.mxu1 %v692_v31  ;;  %1074 = vmatprep.mubr.msk.bf16.mxu1 %vm1168_vm0, %v1167_v0 }
 0x228   : > { %1075 = vmatmul.mubr.msk.bf16.vlgmr.msra.gmra.mrb[12].mxu1 %vm289_vm1, %v685_v32  ;;  %v343_v32 = vmul.f32 1.442695, %v342_v16  ;;  %v489_v16 = vld [vmem:[#allocation3 + $0x8] sm:$0xff] }
 0x2e3   : > { %v1290_v33 = vpop.f32.mrb[0].mxu1 }
 0x2e4   : > { %v1046_v34 = vpop.f32.mrb[1].mxu1 }
 0x2e5   : > { %v407_v35 = vpop.f32.mrb[2].mxu1 }
 0x2e6   : > { %v1047_v36 = vpop.f32.mrb[3].mxu1 }
 0x2eb   : > { %v465_v37 = vpop.f32.mrb[4].mxu1 }
 0x2ec   : > { %v1052_v38 = vpop.f32.mrb[5].mxu1  ;;  %v473_v39 = vsel %vm337_vm3, %v465_v37, -inf }
 0x2ed   : > { %474 = vmax.xlane.f32.xlu1 %v473_v39  ;;  %v468_v40 = vpop.f32.mrb[6].mxu1 }
 0x2ee   : > { %v1053_v41 = vpop.f32.mrb[7].mxu1 }
 0x2f3   : > { %v598_v42 = vpop.f32.mrb[8].mxu1 }
 0x2f4   : > { %v1064_v43 = vpop.f32.mrb[9].mxu1  ;;  %v606_v44 = vsel %vm337_vm3, %v598_v42, -inf }
 0x2f5   : > { %607 = vmax.xlane.f32.xlu0 %v606_v44  ;;  %v601_v45 = vpop.f32.mrb[10].mxu1 }
 0x2f6   : > { %v1065_v46 = vpop.f32.mrb[11].mxu1  ;;  %v622_v45 = vld [vmem:[#allocation3 + $0x10] sm:$0xff] }
 0x2fb   : > { %v728_v47 = vpop.f32.mrb[12].mxu1 }
 0x2fc   : > { %v1076_v48 = vpop.f32.mrb[13].mxu1  ;;  %v736_v49 = vsel %vm337_vm3, %v728_v47, -inf }
 0x2fd   : > { %737 = vmax.xlane.f32.xlu1 %v736_v49  ;;  %v731_v50 = vpop.f32.mrb[14].mxu1 }
 0x2fe   : > { %v1077_v51 = vpop.f32.mrb[15].mxu1  ;;  %v752_v50 = vld [vmem:[#allocation3 + $0x18] sm:$0xff] }
 0x37a   : > { %v475_v53 = vpop.xlane.xlu1 %474 }
 0x37b   : > { %v476_v54 = vmax.f32 %v472_v52, %v475_v53 }
 0x37d   : > { %v477_v55 = vsub.f32 %v472_v52, %v476_v54  ;;  %496 = vst.msk [vmem:[#allocation2 + $0x8] sm:$0xff] %vm276_vm2, %v476_v54  ;;  %482 = vperm.xlu1 %1116, %v476_v54  }
 0x37f   : > { %v478_v24 = vmul.f32 1.442695, %v477_v55 }
 0x382   : > { %v608_v57 = vpop.xlane.xlu0 %607 }
 0x383   : > { %v1299_v58 = vmax.f32 %v1296_v56, %v608_v57 }
 0x385   : > { %v610_v59 = vsub.f32 %v1296_v56, %v1299_v58  ;;  %629 = vst.msk [vmem:[#allocation2 + $0x10] sm:$0xff] %vm276_vm2, %v1299_v58  ;;  %615 = vperm.xlu0 %1115, %v1299_v58  }
 0x387   : > { %v611_v35 = vmul.f32 1.442695, %v610_v59 }
 0x38a   : > { %v738_v61 = vpop.xlane.xlu1 %737 }
 0x38b   : > { %v739_v62 = vmax.f32 %v735_v60, %v738_v61 }
 0x38d   : > { %v740_v1 = vsub.f32 %v735_v60, %v739_v62  ;;  %759 = vst.msk [vmem:[#allocation2 + $0x18] sm:$0xff] %vm276_vm2, %v739_v62  ;;  %745 = vperm.xlu1 %1116, %v739_v62  }
 0x38f   : > { %v741_v27 = vmul.f32 1.442695, %v740_v1 }
 0x391   : > { %501 = vrot.lane.b32.xlu1 %v1012_v63, %s1171_s23 }
 0x395   : > { %631 = vrot.lane.b32.xlu1 %v1012_v63, %s1172_s24 }
 0x399   : > { %761 = vrot.lane.b32.xlu1 %v1012_v63, %s1173_s25 }
 0x3bd   : > { %356 = vadd.xlane.f32.xlu1 %v355_v2 }
 0x3fc   : > { %v483_v3 = vpop.permute.xlu1 %482 }
 0x3fd   : > { %v485_v4 = vsub.f32 %v465_v37, %v483_v3 }
 0x3ff   : > { %v486_v5 = vmul.f32 1.442695, %v485_v4 }
 0x401   : > { %1121 = vpow2.f32 %v486_v5 }
 0x404   : > { %v616_v6 = vpop.permute.xlu0 %615 }
 0x405   : > { %v618_v7 = vsub.f32 %v598_v42, %v616_v6 }
 0x407   : > { %v619_v8 = vmul.f32 1.442695, %v618_v7 }
 0x409   : > { %1123 = vpow2.f32 %v619_v8 }
 0x40b   : > { %v1122_v9 = vpop.eup %1121 }
 0x40c   : > { %v746_v10 = vpop.permute.xlu1 %745  ;;  %v491_v11 = vsel %vm337_vm3, %v1122_v9, 0.0  ;;  %v497_v20 = vpack.c.bf16 %v1122_v9, %v1122_v9 }
 0x40d   : > { %v748_v12 = vsub.f32 %v728_v47, %v746_v10  ;;  %492 = vadd.xlane.f32.xlu0 %v491_v11 }
 0x40f   : > { %v749_v14 = vmul.f32 1.442695, %v748_v12 }
 0x410   : > { %v502_v17 = vpop.permute.xlu1 %501 }
 0x411   : > { %1125 = vpow2.f32 %v749_v14  ;;  %v507_v18 = vsel %vm366_vm4, %v502_v17, 0 }
 0x412   : > { %1055 = vmatpush3.bf16.msra.mxu0 %v507_v18  ;;  %1127 = vpow2.f32 %v478_v24 }
 0x413   : > { %v1124_v19 = vpop.eup %1123  ;;  %1066 = vmatprep.subr.bf16.mxu0 %v1167_v0  ;;  %1129 = vpow2.f32 %v741_v27 }
 0x414   : > { %v624_v21 = vsel %vm337_vm3, %v1124_v19, 0.0  ;;  %v632_v22 = vpop.permute.xlu1 %631  ;;  %v630_v28 = vpack.c.bf16 %v1124_v19, %v1124_v19  ;;  %1131 = vpow2.f32 %v343_v32 }
 0x415   : > { %1057 = vmatmul.mubr.msk.bf16.vlgmr.msra.gmra.mrb[4].mxu0 %vm337_vm3, %v497_v20  ;;  %625 = vadd.xlane.f32.xlu1 %v624_v21  ;;  %v637_v23 = vsel %vm366_vm4, %v632_v22, 0  ;;  %1133 = vpow2.f32 %v611_v35 }
 0x416   : > { %1067 = vmatpush3.bf16.msra.mxu0 %v637_v23  ;;  %1068 = vmatprep.mubr.msk.bf16.mxu0 %vm1168_vm0, %v1167_v0 }
 0x417   : > { %1078 = vmatprep.subr.bf16.mxu0 %v1167_v0 }
 0x418   : > { %v762_v25 = vpop.permute.xlu1 %761 }
 0x419   : > { %v767_v29 = vsel %vm366_vm4, %v762_v25, 0 }
 0x41b   : > { %v1126_v26 = vpop.eup %1125 }
 0x41c   : > { %v754_v30 = vsel %vm337_vm3, %v1126_v26, 0.0  ;;  %v760_v31 = vpack.c.bf16 %v1126_v26, %v1126_v26  ;;  %v1128_v34 = vpop.eup %1127 }
 0x41d   : > { %755 = vadd.xlane.f32.xlu0 %v754_v30  ;;  %1069 = vmatmul.mubr.msk.bf16.vlgmr.msra.gmra.mrb[8].mxu0 %vm337_vm3, %v630_v28  ;;  %v1130_v36 = vpop.eup %1129  ;;  %v490_v42 = vmul.f32 %v1128_v34, %v489_v16 }
 0x41e   : > { %1079 = vmatpush3.bf16.msra.mxu0 %v767_v29  ;;  %1080 = vmatprep.mubr.msk.bf16.mxu0 %vm1168_vm0, %v1167_v0  ;;  %v1132_v37 = vpop.eup %1131  ;;  %v353_v0 = vld [vmem:[#allocation3] sm:$0xff]  ;;  %v753_v51 = vmul.f32 %v1130_v36, %v752_v50 }
 0x41f   : > { %v1134_v38 = vpop.eup %1133  ;;  %v354_v39 = vmul.f32 %v1132_v37, %v353_v0 }
 0x420   : > { %v623_v46 = vmul.f32 %v1134_v38, %v622_v45 }
 0x425   : > { %1081 = vmatmul.mubr.msk.bf16.vlgmr.msra.gmra.mrb[12].mxu0 %vm337_vm3, %v760_v31 }
 0x426   : > { %551 = vperm.xlu1 %1116, %v1128_v34  }
 0x42a   : > { %811 = vperm.xlu1 %1116, %v1130_v36  }
 0x433   : > { %412 = vperm.xlu0 %1115, %v1132_v37  }
 0x437   : > { %681 = vperm.xlu0 %1115, %v1134_v38  }
 0x44a   : > { %v357_v40 = vpop.xlane.xlu1 %356 }
 0x44b   : > { %v358_v41 = vadd.f32 %v357_v40, %v354_v39 }
 0x44d   : > { %360 = vst.msk [vmem:[#allocation3] sm:$0xff] %vm276_vm2, %v358_v41 }
 0x454   : > { %v841_v13 = vld [vmem:[#allocation3] sm:$0xff] }
 0x455   : > { %1135 = vrcp.f32 %v841_v13 }
 0x45f   : > { %v1136_v15 = vpop.eup %1135 }
 0x460   : > { %845 = vperm.xlu0 %1115, %v1136_v15  }
 0x49a   : > { %v493_v43 = vpop.xlane.xlu0 %492 }
 0x49b   : > { %v494_v44 = vadd.f32 %v493_v43, %v490_v42 }
 0x49d   : > { %495 = vst.msk [vmem:[#allocation3 + $0x8] sm:$0xff] %vm276_vm2, %v494_v44 }
 0x4a2   : > { %v626_v47 = vpop.xlane.xlu1 %625 }
 0x4a3   : > { %v627_v48 = vadd.f32 %v626_v47, %v623_v46 }
 0x4a4   : > { %v848_v49 = vld [vmem:[#allocation3 + $0x8] sm:$0xff] }
 0x4a5   : > { %628 = vst.msk [vmem:[#allocation3 + $0x10] sm:$0xff] %vm276_vm2, %v627_v48  ;;  %1137 = vrcp.f32 %v848_v49 }
 0x4a6   : > { %v552_v8 = vpop.permute.xlu1 %551 }
 0x4aa   : > { %v756_v52 = vpop.xlane.xlu0 %755  ;;  %v812_v10 = vpop.permute.xlu1 %811 }
 0x4ab   : > { %v757_v53 = vadd.f32 %v756_v52, %v753_v51 }
 0x4ac   : > { %v855_v55 = vld [vmem:[#allocation3 + $0x10] sm:$0xff] }
 0x4ad   : > { %758 = vst.msk [vmem:[#allocation3 + $0x18] sm:$0xff] %vm276_vm2, %v757_v53  ;;  %1139 = vrcp.f32 %v855_v55 }
 0x4af   : > { %v1138_v54 = vpop.eup %1137 }
 0x4b0   : > { %852 = vperm.xlu1 %1116, %v1138_v54  }
 0x4b2   : > { %v413_v9 = vpop.permute.xlu0 %412 }
 0x4b3   : > { %v831_v18 = vsel %vm289_vm1, %v413_v9, %v552_v8 }
 0x4b4   : > { %v862_v60 = vld [vmem:[#allocation3 + $0x18] sm:$0xff] }
 0x4b5   : > { %1141 = vrcp.f32 %v862_v60 }
 0x4b6   : > { %v682_v11 = vpop.permute.xlu0 %681 }
 0x4b7   : > { %v1140_v2 = vpop.eup %1139  ;;  %v832_v19 = vsel %vm827_vm5, %v831_v18, %v682_v11 }
 0x4b8   : > { %v833_v22 = vsel %vm829_vm6, %v832_v19, %v812_v10 }
 0x4b9   : > { %v835_v27 = vmul.f32 0.0, %v833_v22 }
 0x4bf   : > { %v1142_v7 = vpop.eup %1141 }
 0x4df   : > { %v846_v14 = vpop.permute.xlu0 %845 }
 0x4e8   : > { %v543_v56 = vpop.f32.mrb[4].mxu0 }
 0x4e9   : > { %815 = vrot.lane.b32.xlu1 %v543_v56, %s1173_s25  ;;  %v1058_v57 = vpop.f32.mrb[5].mxu0 }
 0x4ea   : > { %v546_v58 = vpop.f32.mrb[6].mxu0 }
 0x4eb   : > { %v1059_v59 = vpop.f32.mrb[7].mxu0 }
 0x4f0   : > { %v673_v61 = vpop.f32.mrb[8].mxu0 }
 0x4f1   : > { %819 = vrot.lane.b32.xlu0 %v673_v61, %s1172_s24  ;;  %v1070_v62 = vpop.f32.mrb[9].mxu0 }
 0x4f2   : > { %v676_v63 = vpop.f32.mrb[10].mxu0 }
 0x4f3   : > { %v1071_v1 = vpop.f32.mrb[11].mxu0 }
 0x4f5   : > { %859 = vperm.xlu0 %1115, %v1140_v2  }
 0x4f8   : > { %v803_v3 = vpop.f32.mrb[12].mxu0 }
 0x4f9   : > { %823 = vrot.lane.b32.xlu1 %v803_v3, %s1171_s23  ;;  %v1082_v4 = vpop.f32.mrb[13].mxu0 }
 0x4fa   : > { %v806_v5 = vpop.f32.mrb[14].mxu0 }
 0x4fb   : > { %v1083_v6 = vpop.f32.mrb[15].mxu0 }
 0x4fd   : > { %866 = vperm.xlu1 %1116, %v1142_v7  }
 0x52f   : > { %v853_v12 = vpop.permute.xlu1 %852 }
 0x530   : > { %v869_v28 = vsel %vm289_vm1, %v846_v14, %v853_v12 }
 0x55b   : > { %v816_v17 = vpop.permute.xlu1 %815 }
 0x55c   : > { %v826_v23 = vsel %vm289_vm1, %v1290_v33, %v816_v17 }
 0x563   : > { %v820_v20 = vpop.permute.xlu0 %819 }
 0x564   : > { %v828_v24 = vsel %vm827_vm5, %v826_v23, %v820_v20 }
 0x56b   : > { %v824_v21 = vpop.permute.xlu1 %823 }
 0x56c   : > { %v830_v25 = vsel %vm829_vm6, %v828_v24, %v824_v21 }
 0x56d   : > { %v836_v29 = vadd.f32 %v835_v27, %v830_v25 }
 0x574   : > { %v860_v26 = vpop.permute.xlu0 %859 }
 0x575   : > { %v870_v30 = vsel %vm827_vm5, %v869_v28, %v860_v26 }
 0x57c   : > { %v867_v31 = vpop.permute.xlu1 %866 }
 0x57d   : > { %v871_v32 = vsel %vm829_vm6, %v870_v30, %v867_v31 }
 0x57e   : > { %v873_v34 = vmul.f32 %v871_v32, %v836_v29 }
 0x580   : > { %v874_v35 = vpack.c.bf16 %v873_v34, %v873_v34 }
 0x582   : > { %875 = vst [vmem:[%s270_s4] sm:$0xf] %v874_v35 }
 0x583 PF: > { %s13_s14 = sadd.s32 1, %s1165_s14   ;;  %s1363_s12 = smov %s1161_s13 }
 0x584   : > { %p10_p5 = scmp.ge.s32.totalorder %s13_s14, 4   ;;  %s1364_s13 = smov %s1366_s15 }
 0x586   :  { %12 = sbr.rel (!%p10_p5) target bundleno = 2 (0x2), region = 82 }

</bundles_post_ra>
